<compile_context>
chip_gen: v6e
topology: v6e:2x2x1
jax: 0.10.0
libtpu: 0.0.40
codegen_flags: <defaults>
</compile_context>

<pallas_src>
import functools
import math

import jax
import jax.numpy as jnp
from jax import lax
from jax.experimental import pallas as pl
from jax.experimental.pallas import tpu as pltpu


def _layer_norm(x, gamma, beta, eps=1e-5):
    # PyTorch nn.LayerNorm: biased variance over last dim, eps inside rsqrt.
    mu = jnp.mean(x, axis=-1, keepdims=True)
    var = jnp.mean((x - mu) ** 2, axis=-1, keepdims=True)
    return (x - mu) * lax.rsqrt(var + eps) * gamma + beta


def _gelu_exact(x):
    # nn.GELU() default = exact erf formulation.
    return 0.5 * x * (1.0 + lax.erf(x * (1.0 / math.sqrt(2.0))))


def block_kernel(x_ref, wqkv_ref, wproj_ref, bproj_ref,
                 ln1_g_ref, ln1_b_ref, w1_ref, b1_ref, w2_ref, b2_ref,
                 ln2_g_ref, ln2_b_ref, o_ref, *, n_heads):
    Bblk, T, C = x_ref.shape
    hs = C // n_heads

    x3 = x_ref[...]                          # (Bblk, T, C) f32 (residual path)
    x = x3.reshape(Bblk * T, C)              # flattened rows: M = Bblk*T
    x_bf = x.astype(jnp.bfloat16)            # bf16 MXU operand

    # --- fused QKV projection: one MXU pass with N = 3C (bf16 x bf16 -> f32) --
    qkv = jnp.dot(x_bf, wqkv_ref[...], preferred_element_type=jnp.float32)
    qkv_bf = qkv.astype(jnp.bfloat16).reshape(Bblk, T, 3 * C)

    # --- causal mask: built once per grid step, broadcast to all heads --------
    row = lax.broadcasted_iota(jnp.int32, (1, T, T), 1)
    col = lax.broadcasted_iota(jnp.int32, (1, T, T), 2)
    causal = col <= row                      # (1, T, T) tril mask

    # --- masked multi-head attention -------------------------------------------
    # Per-head weights are packed column-wise (head h owns columns
    # [h*hs, (h+1)*hs)), matching torch.cat of the head outputs.
    # NOTE: reference AttentionHead does NOT scale logits by 1/sqrt(head_size).
    head_outs = []
    for h in range(n_heads):                 # n_heads is static (unrolled)
        qh = qkv_bf[:, :, 0 * C + h * hs: 0 * C + (h + 1) * hs]   # (Bblk,T,hs)
        kh = qkv_bf[:, :, 1 * C + h * hs: 1 * C + (h + 1) * hs]
        vh = qkv_bf[:, :, 2 * C + h * hs: 2 * C + (h + 1) * hs]
        wei = jnp.einsum('bqd,bkd->bqk', qh, kh,
                         preferred_element_type=jnp.float32)      # (Bblk,T,T)
        wei = jnp.where(causal, wei, -jnp.inf)
        wei = wei - jnp.max(wei, axis=-1, keepdims=True)
        e = jnp.exp(wei)
        p = e * pl.reciprocal(jnp.sum(e, axis=-1, keepdims=True), approx=True)
        head_outs.append(
            jnp.einsum('bqk,bkd->bqd', p.astype(jnp.bfloat16), vh,
                       preferred_element_type=jnp.float32))       # (Bblk,T,hs)

    # head-concat kept in registers (no VMEM scratch round trip)
    attn = jnp.concatenate(head_outs, axis=-1).reshape(Bblk * T, C)

    # --- output projection + AddNorm 1 (residual + LN in f32) ------------------
    proj = jnp.dot(attn.astype(jnp.bfloat16), wproj_ref[...],
                   preferred_element_type=jnp.float32) + bproj_ref[...]
    h1 = _layer_norm(proj + x, ln1_g_ref[...], ln1_b_ref[...])

    # --- FeedForward (Linear -> GELU -> Linear; dropout = identity) ------------
    ff = jnp.dot(h1.astype(jnp.bfloat16), w1_ref[...],
                 preferred_element_type=jnp.float32) + b1_ref[...]
    ff = _gelu_exact(ff)
    ff = jnp.dot(ff.astype(jnp.bfloat16), w2_ref[...],
                 preferred_element_type=jnp.float32) + b2_ref[...]

    # --- AddNorm 2 --------------------------------------------------------------
    out = _layer_norm(ff + h1, ln2_g_ref[...], ln2_b_ref[...])
    o_ref[...] = out.reshape(Bblk, T, C).astype(o_ref.dtype)


def _vmem_limit_bytes():
    cap = 128 * 1024 * 1024
    try:
        cap = int(pltpu.get_tpu_info().vmem_capacity_bytes)
    except Exception:
        pass
    # Leave ~25% headroom for compiler internal scratch / IO double-buffers:
    # v7x (64 MiB physical) -> ~48 MiB; v5e/v6e (128 MiB) -> capped at 100 MiB.
    return max(32 * 1024 * 1024, min(100 * 1024 * 1024, (cap * 3) // 4))


def _pick_b_block(B, T, C, vmem_limit_bytes):
    """Largest batch divisor that keeps >=2 grid steps (v7x: 2 TCs) and fits
    a conservative activation-VMEM estimate; grows M = b_block*T toward the
    MXU row count."""
    budget = vmem_limit_bytes // 2
    best = 1
    for d in range(1, B + 1):
        if B % d:
            continue
        if B >= 2 and B // d < 2:        # keep the grid shardable across 2 TCs
            continue
        if d * T > 1024:                 # enough MXU rows; stop growing tiles
            continue
        # x/out double-buffers + qkv/attn/h1/ffn activations + per-head logits
        act_bytes = 4 * d * T * (16 * C + T)
        if act_bytes > budget:
            continue
        best = max(best, d)
    return best


def make_block_forward(B, T, C, n_heads, *, b_block=None,
                       single_buffer_weights=True):
    assert C % n_heads == 0
    H = 4 * C
    vmem_limit = _vmem_limit_bytes()
    if b_block is None:
        b_block = _pick_b_block(B, T, C, vmem_limit)
    assert B % b_block == 0, "batch must be divisible by the batch tile"
    kernel = functools.partial(block_kernel, n_heads=n_heads)

    # Grid-invariant weights: constant index_map; request single-buffering so
    # the ~12*C^2 weight footprint is not doubled (matters on v7x's 64 MiB).
    wspec_kwargs = {"pipeline_mode": pl.Buffered(1)} if single_buffer_weights else {}

    def wfull(shape):
        n = len(shape)
        return pl.BlockSpec(shape, lambda b, n=n: (0,) * n, **wspec_kwargs)

    in_specs = [
        pl.BlockSpec((b_block, T, C), lambda b: (b, 0, 0)),   # x (batch tile)
        wfull((C, 3 * C)),                                    # fused Wq|Wk|Wv (bf16)
        wfull((C, C)), wfull((1, C)),                         # Wproj (bf16), bproj
        wfull((1, C)), wfull((1, C)),                         # ln1 gamma, beta
        wfull((C, H)), wfull((1, H)),                         # FF W1 (bf16), b1
        wfull((H, C)), wfull((1, C)),                         # FF W2 (bf16), b2
        wfull((1, C)), wfull((1, C)),                         # ln2 gamma, beta
    ]
    call = pl.pallas_call(
        kernel,
        out_shape=jax.ShapeDtypeStruct((B, T, C), jnp.float32),
        grid=(B // b_block,),
        in_specs=in_specs,
        out_specs=pl.BlockSpec((b_block, T, C), lambda b: (b, 0, 0)),
        compiler_params=pltpu.CompilerParams(
            dimension_semantics=("parallel",),    # shardable batch axis (2 TCs on v7x)
            vmem_limit_bytes=vmem_limit,
        ),
    )

    def fwd(x, wq, wk, wv, wproj, bproj, ln1_g, ln1_b, w1, b1, w2, b2,
            ln2_g, ln2_b):
        # Fuse QKV and store matmul weights bf16 at the call boundary (halves
        # weight DMA / VMEM). Biases & LN params stay f32 (f32 epilogue).
        wqkv = jnp.concatenate([wq, wk, wv], axis=1).astype(jnp.bfloat16)
        return call(x, wqkv,
                    wproj.astype(jnp.bfloat16), bproj,
                    ln1_g, ln1_b,
                    w1.astype(jnp.bfloat16), b1,
                    w2.astype(jnp.bfloat16), b2,
                    ln2_g, ln2_b)

    return fwd


if __name__ == "__main__":
    # Small shapes consistent with Block(d_model, max_seq_len, n_embed, n_heads)
    B, T = 4, 8                  # batch, sequence (== max_seq_len)
    n_embed, n_heads = 32, 4     # head_size = 8
    C, H = n_embed, 4 * n_embed

    key = jax.random.PRNGKey(0)
    ks = jax.random.split(key, 9)
    scale = 0.05

    x      = jax.random.normal(ks[0], (B, T, C), jnp.float32)
    wq     = jax.random.normal(ks[1], (C, C), jnp.float32) * scale
    wk     = jax.random.normal(ks[2], (C, C), jnp.float32) * scale
    wv     = jax.random.normal(ks[3], (C, C), jnp.float32) * scale
    wproj  = jax.random.normal(ks[4], (C, C), jnp.float32) * scale
    bproj  = jax.random.normal(ks[5], (1, C), jnp.float32) * scale
    w1     = jax.random.normal(ks[6], (C, H), jnp.float32) * scale
    b1     = jax.random.normal(ks[7], (1, H), jnp.float32) * scale
    w2     = jax.random.normal(ks[8], (H, C), jnp.float32) * scale
    b2     = jnp.zeros((1, C), jnp.float32)
    ln1_g  = jnp.ones((1, C), jnp.float32)
    ln1_b  = jnp.zeros((1, C), jnp.float32)
    ln2_g  = jnp.ones((1, C), jnp.float32)
    ln2_b  = jnp.zeros((1, C), jnp.float32)

    args = (x, wq, wk, wv, wproj, bproj, ln1_g, ln1_b,
            w1, b1, w2, b2, ln2_g, ln2_b)

    def run(single_buffer_weights):
        fwd = make_block_forward(B, T, C, n_heads,
                                 single_buffer_weights=single_buffer_weights)
        out = fwd(*args)
        jax.block_until_ready(out)
        return out

    try:
        out = run(True)
    except Exception:
        # pipeline_mode=pl.Buffered(1) not supported on this jax/libtpu build;
        # fall back to default (double-buffered) weight BlockSpecs.
        out = run(False)

    assert out.shape == (B, T, C)
    print("KERNEL_OK")
</pallas_src>

<mosaic_0001>
module attributes {stable_mosaic.version = 11 : i64} {
  func.func @block_kernel(%arg0: i32, %arg1: memref<2x8x32xf32, #tpu.memory_space<vmem>>, %arg2: memref<32x96xbf16, #tpu.memory_space<vmem>>, %arg3: memref<32x32xbf16, #tpu.memory_space<vmem>>, %arg4: memref<1x32xf32, #tpu.memory_space<vmem>>, %arg5: memref<1x32xf32, #tpu.memory_space<vmem>>, %arg6: memref<1x32xf32, #tpu.memory_space<vmem>>, %arg7: memref<32x128xbf16, #tpu.memory_space<vmem>>, %arg8: memref<1x128xf32, #tpu.memory_space<vmem>>, %arg9: memref<128x32xbf16, #tpu.memory_space<vmem>>, %arg10: memref<1x32xf32, #tpu.memory_space<vmem>>, %arg11: memref<1x32xf32, #tpu.memory_space<vmem>>, %arg12: memref<1x32xf32, #tpu.memory_space<vmem>>, %arg13: memref<2x8x32xf32, #tpu.memory_space<vmem>>) attributes {dimension_semantics = [#tpu.dimension_semantics<parallel>], iteration_bounds = array<i64: 2>, scalar_prefetch = 0 : i64, scratch_operands = 0 : i64, tpu.core_type = #tpu.core_type<tc>, window_params = [{transform_indices = @transform_0, window_bounds = array<i64: 2, 8, 32>}, {pipeline_mode = #tpu.pipeline_mode<synchronous>, transform_indices = @transform_1, window_bounds = array<i64: 32, 96>}, {pipeline_mode = #tpu.pipeline_mode<synchronous>, transform_indices = @transform_2, window_bounds = array<i64: 32, 32>}, {pipeline_mode = #tpu.pipeline_mode<synchronous>, transform_indices = @transform_3, window_bounds = array<i64: 1, 32>}, {pipeline_mode = #tpu.pipeline_mode<synchronous>, transform_indices = @transform_4, window_bounds = array<i64: 1, 32>}, {pipeline_mode = #tpu.pipeline_mode<synchronous>, transform_indices = @transform_5, window_bounds = array<i64: 1, 32>}, {pipeline_mode = #tpu.pipeline_mode<synchronous>, transform_indices = @transform_6, window_bounds = array<i64: 32, 128>}, {pipeline_mode = #tpu.pipeline_mode<synchronous>, transform_indices = @transform_7, window_bounds = array<i64: 1, 128>}, {pipeline_mode = #tpu.pipeline_mode<synchronous>, transform_indices = @transform_8, window_bounds = array<i64: 128, 32>}, {pipeline_mode = #tpu.pipeline_mode<synchronous>, transform_indices = @transform_9, window_bounds = array<i64: 1, 32>}, {pipeline_mode = #tpu.pipeline_mode<synchronous>, transform_indices = @transform_10, window_bounds = array<i64: 1, 32>}, {pipeline_mode = #tpu.pipeline_mode<synchronous>, transform_indices = @transform_11, window_bounds = array<i64: 1, 32>}, {transform_indices = @transform_12, window_bounds = array<i64: 2, 8, 32>}]} {
    %c0 = arith.constant 0 : index
    %c0_0 = arith.constant 0 : index
    %c0_1 = arith.constant 0 : index
    %0 = vector.load %arg1[%c0, %c0_0, %c0_1] : memref<2x8x32xf32, #tpu.memory_space<vmem>>, vector<2x8x32xf32>
    %1 = vector.shape_cast %0 : vector<2x8x32xf32> to vector<16x32xf32>
    %2 = arith.truncf %1 : vector<16x32xf32> to vector<16x32xbf16>
    %c0_2 = arith.constant 0 : index
    %c0_3 = arith.constant 0 : index
    %3 = vector.load %arg2[%c0_2, %c0_3] : memref<32x96xbf16, #tpu.memory_space<vmem>>, vector<32x96xbf16>
    %cst = arith.constant dense<0.000000e+00> : vector<16x96xf32>
    %4 = tpu.matmul %2, %3, %cst {dimension_numbers = #tpu.dot_dimension_numbers<[1], [0], [0], [1], [0, 0, 1, 1], [], []>} : vector<16x32xbf16>, vector<32x96xbf16>, vector<16x96xf32> -> vector<16x96xf32>
    %5 = arith.truncf %4 : vector<16x96xf32> to vector<16x96xbf16>
    %6 = vector.shape_cast %5 : vector<16x96xbf16> to vector<2x8x96xbf16>
    %7 = tpu.iota {dimensions = array<i32: 1>} : vector<1x8x8xi32>
    %8 = tpu.iota {dimensions = array<i32: 2>} : vector<1x8x8xi32>
    %9 = arith.cmpi sle, %8, %7 : vector<1x8x8xi32>
    %10 = vector.extract_strided_slice %6 {offsets = [0, 0, 0], sizes = [2, 8, 8], strides = [1, 1, 1]} : vector<2x8x96xbf16> to vector<2x8x8xbf16>
    %11 = vector.extract_strided_slice %6 {offsets = [0, 0, 32], sizes = [2, 8, 8], strides = [1, 1, 1]} : vector<2x8x96xbf16> to vector<2x8x8xbf16>
    %12 = vector.extract_strided_slice %6 {offsets = [0, 0, 64], sizes = [2, 8, 8], strides = [1, 1, 1]} : vector<2x8x96xbf16> to vector<2x8x8xbf16>
    "tpu.trace_start"() <{level = 10 : i32, message = "bqd,bkd->bqk"}> : () -> ()
    %cst_4 = arith.constant dense<0.000000e+00> : vector<2x8x8xf32>
    %13 = tpu.matmul %10, %11, %cst_4 {dimension_numbers = #tpu.dot_dimension_numbers<[2], [2], [1], [1], [0, 0, 0, 1, 1, 1], [0], [0]>} : vector<2x8x8xbf16>, vector<2x8x8xbf16>, vector<2x8x8xf32> -> vector<2x8x8xf32>
    %cst_5 = arith.constant 0xFF800000 : f32
    "tpu.trace_stop"() : () -> ()
    %14 = vector.shape_cast %9 : vector<1x8x8xi1> to vector<1x8x8xi1>
    %15 = vector.broadcast %14 : vector<1x8x8xi1> to vector<2x8x8xi1>
    %16 = vector.broadcast %cst_5 : f32 to vector<2x8x8xf32>
    %17 = arith.select %15, %13, %16 : vector<2x8x8xi1>, vector<2x8x8xf32>
    %cst_6 = arith.constant dense<0xFF800000> : vector<2x8xf32>
    %18 = vector.multi_reduction <maximumf>, %17, %cst_6 [2] : vector<2x8x8xf32> to vector<2x8xf32>
    %19 = vector.shape_cast %18 : vector<2x8xf32> to vector<2x8x1xf32>
    %20 = vector.broadcast %19 : vector<2x8x1xf32> to vector<2x8x8xf32>
    %21 = arith.subf %17, %20 : vector<2x8x8xf32>
    %22 = math.exp %21 : vector<2x8x8xf32>
    %cst_7 = arith.constant dense<0.000000e+00> : vector<2x8xf32>
    %23 = vector.multi_reduction <add>, %22, %cst_7 [2] : vector<2x8x8xf32> to vector<2x8xf32>
    %24 = vector.shape_cast %23 : vector<2x8xf32> to vector<2x8x1xf32>
    %25 = tpu.reciprocal %24 {approx = true} : vector<2x8x1xf32> -> vector<2x8x1xf32>
    %26 = vector.broadcast %25 : vector<2x8x1xf32> to vector<2x8x8xf32>
    %27 = arith.mulf %22, %26 : vector<2x8x8xf32>
    %28 = arith.truncf %27 : vector<2x8x8xf32> to vector<2x8x8xbf16>
    "tpu.trace_start"() <{level = 10 : i32, message = "bqk,bkd->bqd"}> : () -> ()
    %cst_8 = arith.constant dense<0.000000e+00> : vector<2x8x8xf32>
    %29 = tpu.matmul %28, %12, %cst_8 {dimension_numbers = #tpu.dot_dimension_numbers<[2], [1], [1], [2], [0, 0, 0, 1, 1, 2], [0], [0]>} : vector<2x8x8xbf16>, vector<2x8x8xbf16>, vector<2x8x8xf32> -> vector<2x8x8xf32>
    "tpu.trace_stop"() : () -> ()
    %30 = vector.extract_strided_slice %6 {offsets = [0, 0, 8], sizes = [2, 8, 8], strides = [1, 1, 1]} : vector<2x8x96xbf16> to vector<2x8x8xbf16>
    %31 = vector.extract_strided_slice %6 {offsets = [0, 0, 40], sizes = [2, 8, 8], strides = [1, 1, 1]} : vector<2x8x96xbf16> to vector<2x8x8xbf16>
    %32 = vector.extract_strided_slice %6 {offsets = [0, 0, 72], sizes = [2, 8, 8], strides = [1, 1, 1]} : vector<2x8x96xbf16> to vector<2x8x8xbf16>
    "tpu.trace_start"() <{level = 10 : i32, message = "bqd,bkd->bqk"}> : () -> ()
    %cst_9 = arith.constant dense<0.000000e+00> : vector<2x8x8xf32>
    %33 = tpu.matmul %30, %31, %cst_9 {dimension_numbers = #tpu.dot_dimension_numbers<[2], [2], [1], [1], [0, 0, 0, 1, 1, 1], [0], [0]>} : vector<2x8x8xbf16>, vector<2x8x8xbf16>, vector<2x8x8xf32> -> vector<2x8x8xf32>
    %cst_10 = arith.constant 0xFF800000 : f32
    "tpu.trace_stop"() : () -> ()
    %34 = vector.shape_cast %9 : vector<1x8x8xi1> to vector<1x8x8xi1>
    %35 = vector.broadcast %34 : vector<1x8x8xi1> to vector<2x8x8xi1>
    %36 = vector.broadcast %cst_10 : f32 to vector<2x8x8xf32>
    %37 = arith.select %35, %33, %36 : vector<2x8x8xi1>, vector<2x8x8xf32>
    %cst_11 = arith.constant dense<0xFF800000> : vector<2x8xf32>
    %38 = vector.multi_reduction <maximumf>, %37, %cst_11 [2] : vector<2x8x8xf32> to vector<2x8xf32>
    %39 = vector.shape_cast %38 : vector<2x8xf32> to vector<2x8x1xf32>
    %40 = vector.broadcast %39 : vector<2x8x1xf32> to vector<2x8x8xf32>
    %41 = arith.subf %37, %40 : vector<2x8x8xf32>
    %42 = math.exp %41 : vector<2x8x8xf32>
    %cst_12 = arith.constant dense<0.000000e+00> : vector<2x8xf32>
    %43 = vector.multi_reduction <add>, %42, %cst_12 [2] : vector<2x8x8xf32> to vector<2x8xf32>
    %44 = vector.shape_cast %43 : vector<2x8xf32> to vector<2x8x1xf32>
    %45 = tpu.reciprocal %44 {approx = true} : vector<2x8x1xf32> -> vector<2x8x1xf32>
    %46 = vector.broadcast %45 : vector<2x8x1xf32> to vector<2x8x8xf32>
    %47 = arith.mulf %42, %46 : vector<2x8x8xf32>
    %48 = arith.truncf %47 : vector<2x8x8xf32> to vector<2x8x8xbf16>
    "tpu.trace_start"() <{level = 10 : i32, message = "bqk,bkd->bqd"}> : () -> ()
    %cst_13 = arith.constant dense<0.000000e+00> : vector<2x8x8xf32>
    %49 = tpu.matmul %48, %32, %cst_13 {dimension_numbers = #tpu.dot_dimension_numbers<[2], [1], [1], [2], [0, 0, 0, 1, 1, 2], [0], [0]>} : vector<2x8x8xbf16>, vector<2x8x8xbf16>, vector<2x8x8xf32> -> vector<2x8x8xf32>
    "tpu.trace_stop"() : () -> ()
    %50 = vector.extract_strided_slice %6 {offsets = [0, 0, 16], sizes = [2, 8, 8], strides = [1, 1, 1]} : vector<2x8x96xbf16> to vector<2x8x8xbf16>
    %51 = vector.extract_strided_slice %6 {offsets = [0, 0, 48], sizes = [2, 8, 8], strides = [1, 1, 1]} : vector<2x8x96xbf16> to vector<2x8x8xbf16>
    %52 = vector.extract_strided_slice %6 {offsets = [0, 0, 80], sizes = [2, 8, 8], strides = [1, 1, 1]} : vector<2x8x96xbf16> to vector<2x8x8xbf16>
    "tpu.trace_start"() <{level = 10 : i32, message = "bqd,bkd->bqk"}> : () -> ()
    %cst_14 = arith.constant dense<0.000000e+00> : vector<2x8x8xf32>
    %53 = tpu.matmul %50, %51, %cst_14 {dimension_numbers = #tpu.dot_dimension_numbers<[2], [2], [1], [1], [0, 0, 0, 1, 1, 1], [0], [0]>} : vector<2x8x8xbf16>, vector<2x8x8xbf16>, vector<2x8x8xf32> -> vector<2x8x8xf32>
    %cst_15 = arith.constant 0xFF800000 : f32
    "tpu.trace_stop"() : () -> ()
    %54 = vector.shape_cast %9 : vector<1x8x8xi1> to vector<1x8x8xi1>
    %55 = vector.broadcast %54 : vector<1x8x8xi1> to vector<2x8x8xi1>
    %56 = vector.broadcast %cst_15 : f32 to vector<2x8x8xf32>
    %57 = arith.select %55, %53, %56 : vector<2x8x8xi1>, vector<2x8x8xf32>
    %cst_16 = arith.constant dense<0xFF800000> : vector<2x8xf32>
    %58 = vector.multi_reduction <maximumf>, %57, %cst_16 [2] : vector<2x8x8xf32> to vector<2x8xf32>
    %59 = vector.shape_cast %58 : vector<2x8xf32> to vector<2x8x1xf32>
    %60 = vector.broadcast %59 : vector<2x8x1xf32> to vector<2x8x8xf32>
    %61 = arith.subf %57, %60 : vector<2x8x8xf32>
    %62 = math.exp %61 : vector<2x8x8xf32>
    %cst_17 = arith.constant dense<0.000000e+00> : vector<2x8xf32>
    %63 = vector.multi_reduction <add>, %62, %cst_17 [2] : vector<2x8x8xf32> to vector<2x8xf32>
    %64 = vector.shape_cast %63 : vector<2x8xf32> to vector<2x8x1xf32>
    %65 = tpu.reciprocal %64 {approx = true} : vector<2x8x1xf32> -> vector<2x8x1xf32>
    %66 = vector.broadcast %65 : vector<2x8x1xf32> to vector<2x8x8xf32>
    %67 = arith.mulf %62, %66 : vector<2x8x8xf32>
    %68 = arith.truncf %67 : vector<2x8x8xf32> to vector<2x8x8xbf16>
    "tpu.trace_start"() <{level = 10 : i32, message = "bqk,bkd->bqd"}> : () -> ()
    %cst_18 = arith.constant dense<0.000000e+00> : vector<2x8x8xf32>
    %69 = tpu.matmul %68, %52, %cst_18 {dimension_numbers = #tpu.dot_dimension_numbers<[2], [1], [1], [2], [0, 0, 0, 1, 1, 2], [0], [0]>} : vector<2x8x8xbf16>, vector<2x8x8xbf16>, vector<2x8x8xf32> -> vector<2x8x8xf32>
    "tpu.trace_stop"() : () -> ()
    %70 = vector.extract_strided_slice %6 {offsets = [0, 0, 24], sizes = [2, 8, 8], strides = [1, 1, 1]} : vector<2x8x96xbf16> to vector<2x8x8xbf16>
    %71 = vector.extract_strided_slice %6 {offsets = [0, 0, 56], sizes = [2, 8, 8], strides = [1, 1, 1]} : vector<2x8x96xbf16> to vector<2x8x8xbf16>
    %72 = vector.extract_strided_slice %6 {offsets = [0, 0, 88], sizes = [2, 8, 8], strides = [1, 1, 1]} : vector<2x8x96xbf16> to vector<2x8x8xbf16>
    "tpu.trace_start"() <{level = 10 : i32, message = "bqd,bkd->bqk"}> : () -> ()
    %cst_19 = arith.constant dense<0.000000e+00> : vector<2x8x8xf32>
    %73 = tpu.matmul %70, %71, %cst_19 {dimension_numbers = #tpu.dot_dimension_numbers<[2], [2], [1], [1], [0, 0, 0, 1, 1, 1], [0], [0]>} : vector<2x8x8xbf16>, vector<2x8x8xbf16>, vector<2x8x8xf32> -> vector<2x8x8xf32>
    %cst_20 = arith.constant 0xFF800000 : f32
    "tpu.trace_stop"() : () -> ()
    %74 = vector.shape_cast %9 : vector<1x8x8xi1> to vector<1x8x8xi1>
    %75 = vector.broadcast %74 : vector<1x8x8xi1> to vector<2x8x8xi1>
    %76 = vector.broadcast %cst_20 : f32 to vector<2x8x8xf32>
    %77 = arith.select %75, %73, %76 : vector<2x8x8xi1>, vector<2x8x8xf32>
    %cst_21 = arith.constant dense<0xFF800000> : vector<2x8xf32>
    %78 = vector.multi_reduction <maximumf>, %77, %cst_21 [2] : vector<2x8x8xf32> to vector<2x8xf32>
    %79 = vector.shape_cast %78 : vector<2x8xf32> to vector<2x8x1xf32>
    %80 = vector.broadcast %79 : vector<2x8x1xf32> to vector<2x8x8xf32>
    %81 = arith.subf %77, %80 : vector<2x8x8xf32>
    %82 = math.exp %81 : vector<2x8x8xf32>
    %cst_22 = arith.constant dense<0.000000e+00> : vector<2x8xf32>
    %83 = vector.multi_reduction <add>, %82, %cst_22 [2] : vector<2x8x8xf32> to vector<2x8xf32>
    %84 = vector.shape_cast %83 : vector<2x8xf32> to vector<2x8x1xf32>
    %85 = tpu.reciprocal %84 {approx = true} : vector<2x8x1xf32> -> vector<2x8x1xf32>
    %86 = vector.broadcast %85 : vector<2x8x1xf32> to vector<2x8x8xf32>
    %87 = arith.mulf %82, %86 : vector<2x8x8xf32>
    %88 = arith.truncf %87 : vector<2x8x8xf32> to vector<2x8x8xbf16>
    "tpu.trace_start"() <{level = 10 : i32, message = "bqk,bkd->bqd"}> : () -> ()
    %cst_23 = arith.constant dense<0.000000e+00> : vector<2x8x8xf32>
    %89 = tpu.matmul %88, %72, %cst_23 {dimension_numbers = #tpu.dot_dimension_numbers<[2], [1], [1], [2], [0, 0, 0, 1, 1, 2], [0], [0]>} : vector<2x8x8xbf16>, vector<2x8x8xbf16>, vector<2x8x8xf32> -> vector<2x8x8xf32>
    "tpu.trace_stop"() : () -> ()
    %90 = tpu.concatenate %29, %49, %69, %89 in 2 : vector<2x8x8xf32>, vector<2x8x8xf32>, vector<2x8x8xf32>, vector<2x8x8xf32> -> vector<2x8x32xf32>
    %91 = vector.shape_cast %90 : vector<2x8x32xf32> to vector<16x32xf32>
    %92 = arith.truncf %91 : vector<16x32xf32> to vector<16x32xbf16>
    %c0_24 = arith.constant 0 : index
    %c0_25 = arith.constant 0 : index
    %93 = vector.load %arg3[%c0_24, %c0_25] : memref<32x32xbf16, #tpu.memory_space<vmem>>, vector<32x32xbf16>
    %cst_26 = arith.constant dense<0.000000e+00> : vector<16x32xf32>
    %94 = tpu.matmul %92, %93, %cst_26 {dimension_numbers = #tpu.dot_dimension_numbers<[1], [0], [0], [1], [0, 0, 1, 1], [], []>} : vector<16x32xbf16>, vector<32x32xbf16>, vector<16x32xf32> -> vector<16x32xf32>
    %c0_27 = arith.constant 0 : index
    %c0_28 = arith.constant 0 : index
    %95 = vector.load %arg4[%c0_27, %c0_28] : memref<1x32xf32, #tpu.memory_space<vmem>>, vector<1x32xf32>
    %96 = vector.broadcast %95 : vector<1x32xf32> to vector<16x32xf32>
    %97 = arith.addf %94, %96 : vector<16x32xf32>
    %98 = arith.addf %97, %1 : vector<16x32xf32>
    %c0_29 = arith.constant 0 : index
    %c0_30 = arith.constant 0 : index
    %99 = vector.load %arg5[%c0_29, %c0_30] : memref<1x32xf32, #tpu.memory_space<vmem>>, vector<1x32xf32>
    %c0_31 = arith.constant 0 : index
    %c0_32 = arith.constant 0 : index
    %100 = vector.load %arg6[%c0_31, %c0_32] : memref<1x32xf32, #tpu.memory_space<vmem>>, vector<1x32xf32>
    %cst_33 = arith.constant dense<0.000000e+00> : vector<16xf32>
    %101 = vector.multi_reduction <add>, %98, %cst_33 [1] : vector<16x32xf32> to vector<16xf32>
    %102 = vector.shape_cast %101 : vector<16xf32> to vector<16x1xf32>
    %cst_34 = arith.constant 3.200000e+01 : f32
    %103 = vector.broadcast %cst_34 : f32 to vector<16x1xf32>
    %104 = arith.divf %102, %103 : vector<16x1xf32>
    %105 = vector.broadcast %104 : vector<16x1xf32> to vector<16x32xf32>
    %106 = arith.subf %98, %105 : vector<16x32xf32>
    %107 = arith.mulf %106, %106 : vector<16x32xf32>
    %cst_35 = arith.constant dense<0.000000e+00> : vector<16xf32>
    %108 = vector.multi_reduction <add>, %107, %cst_35 [1] : vector<16x32xf32> to vector<16xf32>
    %109 = vector.shape_cast %108 : vector<16xf32> to vector<16x1xf32>
    %cst_36 = arith.constant 3.200000e+01 : f32
    %110 = vector.broadcast %cst_36 : f32 to vector<16x1xf32>
    %111 = arith.divf %109, %110 : vector<16x1xf32>
    %112 = vector.broadcast %104 : vector<16x1xf32> to vector<16x32xf32>
    %113 = arith.subf %98, %112 : vector<16x32xf32>
    %cst_37 = arith.constant 9.99999974E-6 : f32
    %114 = vector.broadcast %cst_37 : f32 to vector<16x1xf32>
    %115 = arith.addf %111, %114 : vector<16x1xf32>
    %116 = math.rsqrt %115 : vector<16x1xf32>
    %117 = vector.broadcast %116 : vector<16x1xf32> to vector<16x32xf32>
    %118 = arith.mulf %113, %117 : vector<16x32xf32>
    %119 = vector.broadcast %99 : vector<1x32xf32> to vector<16x32xf32>
    %120 = arith.mulf %118, %119 : vector<16x32xf32>
    %121 = vector.broadcast %100 : vector<1x32xf32> to vector<16x32xf32>
    %122 = arith.addf %120, %121 : vector<16x32xf32>
    %123 = arith.truncf %122 : vector<16x32xf32> to vector<16x32xbf16>
    %c0_38 = arith.constant 0 : index
    %c0_39 = arith.constant 0 : index
    %124 = vector.load %arg7[%c0_38, %c0_39] : memref<32x128xbf16, #tpu.memory_space<vmem>>, vector<32x128xbf16>
    %cst_40 = arith.constant dense<0.000000e+00> : vector<16x128xf32>
    %125 = tpu.matmul %123, %124, %cst_40 {dimension_numbers = #tpu.dot_dimension_numbers<[1], [0], [0], [1], [0, 0, 1, 1], [], []>} : vector<16x32xbf16>, vector<32x128xbf16>, vector<16x128xf32> -> vector<16x128xf32>
    %c0_41 = arith.constant 0 : index
    %c0_42 = arith.constant 0 : index
    %126 = vector.load %arg8[%c0_41, %c0_42] : memref<1x128xf32, #tpu.memory_space<vmem>>, vector<1x128xf32>
    %127 = vector.broadcast %126 : vector<1x128xf32> to vector<16x128xf32>
    %128 = arith.addf %125, %127 : vector<16x128xf32>
    %cst_43 = arith.constant 5.000000e-01 : f32
    %129 = vector.broadcast %cst_43 : f32 to vector<16x128xf32>
    %130 = arith.mulf %129, %128 : vector<16x128xf32>
    %cst_44 = arith.constant 0.707106769 : f32
    %131 = vector.broadcast %cst_44 : f32 to vector<16x128xf32>
    %132 = arith.mulf %128, %131 : vector<16x128xf32>
    %133 = math.erf %132 : vector<16x128xf32>
    %cst_45 = arith.constant 1.000000e+00 : f32
    %134 = vector.broadcast %cst_45 : f32 to vector<16x128xf32>
    %135 = arith.addf %134, %133 : vector<16x128xf32>
    %136 = arith.mulf %130, %135 : vector<16x128xf32>
    %137 = arith.truncf %136 : vector<16x128xf32> to vector<16x128xbf16>
    %c0_46 = arith.constant 0 : index
    %c0_47 = arith.constant 0 : index
    %138 = vector.load %arg9[%c0_46, %c0_47] : memref<128x32xbf16, #tpu.memory_space<vmem>>, vector<128x32xbf16>
    %cst_48 = arith.constant dense<0.000000e+00> : vector<16x32xf32>
    %139 = tpu.matmul %137, %138, %cst_48 {dimension_numbers = #tpu.dot_dimension_numbers<[1], [0], [0], [1], [0, 0, 1, 1], [], []>} : vector<16x128xbf16>, vector<128x32xbf16>, vector<16x32xf32> -> vector<16x32xf32>
    %c0_49 = arith.constant 0 : index
    %c0_50 = arith.constant 0 : index
    %140 = vector.load %arg10[%c0_49, %c0_50] : memref<1x32xf32, #tpu.memory_space<vmem>>, vector<1x32xf32>
    %141 = vector.broadcast %140 : vector<1x32xf32> to vector<16x32xf32>
    %142 = arith.addf %139, %141 : vector<16x32xf32>
    %143 = arith.addf %142, %122 : vector<16x32xf32>
    %c0_51 = arith.constant 0 : index
    %c0_52 = arith.constant 0 : index
    %144 = vector.load %arg11[%c0_51, %c0_52] : memref<1x32xf32, #tpu.memory_space<vmem>>, vector<1x32xf32>
    %c0_53 = arith.constant 0 : index
    %c0_54 = arith.constant 0 : index
    %145 = vector.load %arg12[%c0_53, %c0_54] : memref<1x32xf32, #tpu.memory_space<vmem>>, vector<1x32xf32>
    %cst_55 = arith.constant dense<0.000000e+00> : vector<16xf32>
    %146 = vector.multi_reduction <add>, %143, %cst_55 [1] : vector<16x32xf32> to vector<16xf32>
    %147 = vector.shape_cast %146 : vector<16xf32> to vector<16x1xf32>
    %cst_56 = arith.constant 3.200000e+01 : f32
    %148 = vector.broadcast %cst_56 : f32 to vector<16x1xf32>
    %149 = arith.divf %147, %148 : vector<16x1xf32>
    %150 = vector.broadcast %149 : vector<16x1xf32> to vector<16x32xf32>
    %151 = arith.subf %143, %150 : vector<16x32xf32>
    %152 = arith.mulf %151, %151 : vector<16x32xf32>
    %cst_57 = arith.constant dense<0.000000e+00> : vector<16xf32>
    %153 = vector.multi_reduction <add>, %152, %cst_57 [1] : vector<16x32xf32> to vector<16xf32>
    %154 = vector.shape_cast %153 : vector<16xf32> to vector<16x1xf32>
    %cst_58 = arith.constant 3.200000e+01 : f32
    %155 = vector.broadcast %cst_58 : f32 to vector<16x1xf32>
    %156 = arith.divf %154, %155 : vector<16x1xf32>
    %157 = vector.broadcast %149 : vector<16x1xf32> to vector<16x32xf32>
    %158 = arith.subf %143, %157 : vector<16x32xf32>
    %cst_59 = arith.constant 9.99999974E-6 : f32
    %159 = vector.broadcast %cst_59 : f32 to vector<16x1xf32>
    %160 = arith.addf %156, %159 : vector<16x1xf32>
    %161 = math.rsqrt %160 : vector<16x1xf32>
    %162 = vector.broadcast %161 : vector<16x1xf32> to vector<16x32xf32>
    %163 = arith.mulf %158, %162 : vector<16x32xf32>
    %164 = vector.broadcast %144 : vector<1x32xf32> to vector<16x32xf32>
    %165 = arith.mulf %163, %164 : vector<16x32xf32>
    %166 = vector.broadcast %145 : vector<1x32xf32> to vector<16x32xf32>
    %167 = arith.addf %165, %166 : vector<16x32xf32>
    %168 = vector.shape_cast %167 : vector<16x32xf32> to vector<2x8x32xf32>
    %c0_60 = arith.constant 0 : index
    %c0_61 = arith.constant 0 : index
    %c0_62 = arith.constant 0 : index
    %169 = vector.load %arg13[%c0_60, %c0_61, %c0_62] : memref<2x8x32xf32, #tpu.memory_space<vmem>>, vector<2x8x32xf32>
    tpu.vector_store %arg13[%c0_60, %c0_61, %c0_62], %168 {strides = array<i32>} : memref<2x8x32xf32, #tpu.memory_space<vmem>>, vector<2x8x32xf32>,
    return
  }
  func.func @transform_0(%arg0: i32) -> (i32, i32, i32) {
    %c0_i32 = arith.constant 0 : i32
    %c0_i32_0 = arith.constant 0 : i32
    %c0_i32_1 = arith.constant 0 : i32
    return %arg0, %c0_i32, %c0_i32_0 : i32, i32, i32
  }
  func.func @transform_1(%arg0: i32) -> (i32, i32) {
    %c0_i32 = arith.constant 0 : i32
    %c0_i32_0 = arith.constant 0 : i32
    %c0_i32_1 = arith.constant 0 : i32
    return %c0_i32, %c0_i32_0 : i32, i32
  }
  func.func @transform_2(%arg0: i32) -> (i32, i32) {
    %c0_i32 = arith.constant 0 : i32
    %c0_i32_0 = arith.constant 0 : i32
    %c0_i32_1 = arith.constant 0 : i32
    return %c0_i32, %c0_i32_0 : i32, i32
  }
  func.func @transform_3(%arg0: i32) -> (i32, i32) {
    %c0_i32 = arith.constant 0 : i32
    %c0_i32_0 = arith.constant 0 : i32
    %c0_i32_1 = arith.constant 0 : i32
    return %c0_i32, %c0_i32_0 : i32, i32
  }
  func.func @transform_4(%arg0: i32) -> (i32, i32) {
    %c0_i32 = arith.constant 0 : i32
    %c0_i32_0 = arith.constant 0 : i32
    %c0_i32_1 = arith.constant 0 : i32
    return %c0_i32, %c0_i32_0 : i32, i32
  }
  func.func @transform_5(%arg0: i32) -> (i32, i32) {
    %c0_i32 = arith.constant 0 : i32
    %c0_i32_0 = arith.constant 0 : i32
    %c0_i32_1 = arith.constant 0 : i32
    return %c0_i32, %c0_i32_0 : i32, i32
  }
  func.func @transform_6(%arg0: i32) -> (i32, i32) {
    %c0_i32 = arith.constant 0 : i32
    %c0_i32_0 = arith.constant 0 : i32
    %c0_i32_1 = arith.constant 0 : i32
    return %c0_i32, %c0_i32_0 : i32, i32
  }
  func.func @transform_7(%arg0: i32) -> (i32, i32) {
    %c0_i32 = arith.constant 0 : i32
    %c0_i32_0 = arith.constant 0 : i32
    %c0_i32_1 = arith.constant 0 : i32
    return %c0_i32, %c0_i32_0 : i32, i32
  }
  func.func @transform_8(%arg0: i32) -> (i32, i32) {
    %c0_i32 = arith.constant 0 : i32
    %c0_i32_0 = arith.constant 0 : i32
    %c0_i32_1 = arith.constant 0 : i32
    return %c0_i32, %c0_i32_0 : i32, i32
  }
  func.func @transform_9(%arg0: i32) -> (i32, i32) {
    %c0_i32 = arith.constant 0 : i32
    %c0_i32_0 = arith.constant 0 : i32
    %c0_i32_1 = arith.constant 0 : i32
    return %c0_i32, %c0_i32_0 : i32, i32
  }
  func.func @transform_10(%arg0: i32) -> (i32, i32) {
    %c0_i32 = arith.constant 0 : i32
    %c0_i32_0 = arith.constant 0 : i32
    %c0_i32_1 = arith.constant 0 : i32
    return %c0_i32, %c0_i32_0 : i32, i32
  }
  func.func @transform_11(%arg0: i32) -> (i32, i32) {
    %c0_i32 = arith.constant 0 : i32
    %c0_i32_0 = arith.constant 0 : i32
    %c0_i32_1 = arith.constant 0 : i32
    return %c0_i32, %c0_i32_0 : i32, i32
  }
  func.func @transform_12(%arg0: i32) -> (i32, i32, i32) {
    %c0_i32 = arith.constant 0 : i32
    %c0_i32_0 = arith.constant 0 : i32
    %c0_i32_1 = arith.constant 0 : i32
    return %arg0, %c0_i32, %c0_i32_0 : i32, i32, i32
  }
}

module attributes {stable_mosaic.version = 11 : i64} {
  func.func @block_kernel(%arg0: i32, %arg1: memref<2x8x32xf32, #tpu.memory_space<vmem>>, %arg2: memref<32x96xbf16, #tpu.memory_space<vmem>>, %arg3: memref<32x32xbf16, #tpu.memory_space<vmem>>, %arg4: memref<1x32xf32, #tpu.memory_space<vmem>>, %arg5: memref<1x32xf32, #tpu.memory_space<vmem>>, %arg6: memref<1x32xf32, #tpu.memory_space<vmem>>, %arg7: memref<32x128xbf16, #tpu.memory_space<vmem>>, %arg8: memref<1x128xf32, #tpu.memory_space<vmem>>, %arg9: memref<128x32xbf16, #tpu.memory_space<vmem>>, %arg10: memref<1x32xf32, #tpu.memory_space<vmem>>, %arg11: memref<1x32xf32, #tpu.memory_space<vmem>>, %arg12: memref<1x32xf32, #tpu.memory_space<vmem>>, %arg13: memref<2x8x32xf32, #tpu.memory_space<vmem>>) attributes {dimension_semantics = [#tpu.dimension_semantics<parallel>], iteration_bounds = array<i64: 2>, scalar_prefetch = 0 : i64, scratch_operands = 0 : i64, tpu.core_type = #tpu.core_type<tc>, window_params = [{transform_indices = @transform_0, window_bounds = array<i64: 2, 8, 32>}, {pipeline_mode = #tpu.pipeline_mode<synchronous>, transform_indices = @transform_1, window_bounds = array<i64: 32, 96>}, {pipeline_mode = #tpu.pipeline_mode<synchronous>, transform_indices = @transform_2, window_bounds = array<i64: 32, 32>}, {pipeline_mode = #tpu.pipeline_mode<synchronous>, transform_indices = @transform_3, window_bounds = array<i64: 1, 32>}, {pipeline_mode = #tpu.pipeline_mode<synchronous>, transform_indices = @transform_4, window_bounds = array<i64: 1, 32>}, {pipeline_mode = #tpu.pipeline_mode<synchronous>, transform_indices = @transform_5, window_bounds = array<i64: 1, 32>}, {pipeline_mode = #tpu.pipeline_mode<synchronous>, transform_indices = @transform_6, window_bounds = array<i64: 32, 128>}, {pipeline_mode = #tpu.pipeline_mode<synchronous>, transform_indices = @transform_7, window_bounds = array<i64: 1, 128>}, {pipeline_mode = #tpu.pipeline_mode<synchronous>, transform_indices = @transform_8, window_bounds = array<i64: 128, 32>}, {pipeline_mode = #tpu.pipeline_mode<synchronous>, transform_indices = @transform_9, window_bounds = array<i64: 1, 32>}, {pipeline_mode = #tpu.pipeline_mode<synchronous>, transform_indices = @transform_10, window_bounds = array<i64: 1, 32>}, {pipeline_mode = #tpu.pipeline_mode<synchronous>, transform_indices = @transform_11, window_bounds = array<i64: 1, 32>}, {transform_indices = @transform_12, window_bounds = array<i64: 2, 8, 32>}]} {
    %c0 = arith.constant 0 : index
    %c0_0 = arith.constant 0 : index
    %c0_1 = arith.constant 0 : index
    %0 = vector.load %arg1[%c0, %c0_0, %c0_1] : memref<2x8x32xf32, #tpu.memory_space<vmem>>, vector<2x8x32xf32>
    %1 = vector.shape_cast %0 : vector<2x8x32xf32> to vector<16x32xf32>
    %2 = arith.truncf %1 : vector<16x32xf32> to vector<16x32xbf16>
    %c0_2 = arith.constant 0 : index
    %c0_3 = arith.constant 0 : index
    %3 = vector.load %arg2[%c0_2, %c0_3] : memref<32x96xbf16, #tpu.memory_space<vmem>>, vector<32x96xbf16>
    %cst = arith.constant dense<0.000000e+00> : vector<16x96xf32>
    %4 = tpu.matmul %2, %3, %cst {dimension_numbers = #tpu.dot_dimension_numbers<[1], [0], [0], [1], [0, 0, 1, 1], [], []>} : vector<16x32xbf16>, vector<32x96xbf16>, vector<16x96xf32> -> vector<16x96xf32>
    %5 = arith.truncf %4 : vector<16x96xf32> to vector<16x96xbf16>
    %6 = vector.shape_cast %5 : vector<16x96xbf16> to vector<2x8x96xbf16>
    %7 = tpu.iota {dimensions = array<i32: 1>} : vector<1x8x8xi32>
    %8 = tpu.iota {dimensions = array<i32: 2>} : vector<1x8x8xi32>
    %9 = arith.cmpi sle, %8, %7 : vector<1x8x8xi32>
    %10 = vector.extract_strided_slice %6 {offsets = [0, 0, 0], sizes = [2, 8, 8], strides = [1, 1, 1]} : vector<2x8x96xbf16> to vector<2x8x8xbf16>
    %11 = vector.extract_strided_slice %6 {offsets = [0, 0, 32], sizes = [2, 8, 8], strides = [1, 1, 1]} : vector<2x8x96xbf16> to vector<2x8x8xbf16>
    %12 = vector.extract_strided_slice %6 {offsets = [0, 0, 64], sizes = [2, 8, 8], strides = [1, 1, 1]} : vector<2x8x96xbf16> to vector<2x8x8xbf16>
    "tpu.trace_start"() <{level = 10 : i32, message = "bqd,bkd->bqk"}> : () -> ()
    %cst_4 = arith.constant dense<0.000000e+00> : vector<2x8x8xf32>
    %13 = tpu.matmul %10, %11, %cst_4 {dimension_numbers = #tpu.dot_dimension_numbers<[2], [2], [1], [1], [0, 0, 0, 1, 1, 1], [0], [0]>} : vector<2x8x8xbf16>, vector<2x8x8xbf16>, vector<2x8x8xf32> -> vector<2x8x8xf32>
    %cst_5 = arith.constant 0xFF800000 : f32
    "tpu.trace_stop"() : () -> ()
    %14 = vector.shape_cast %9 : vector<1x8x8xi1> to vector<1x8x8xi1>
    %15 = vector.broadcast %14 : vector<1x8x8xi1> to vector<2x8x8xi1>
    %16 = vector.broadcast %cst_5 : f32 to vector<2x8x8xf32>
    %17 = arith.select %15, %13, %16 : vector<2x8x8xi1>, vector<2x8x8xf32>
    %cst_6 = arith.constant dense<0xFF800000> : vector<2x8xf32>
    %18 = vector.multi_reduction <maximumf>, %17, %cst_6 [2] : vector<2x8x8xf32> to vector<2x8xf32>
    %19 = vector.shape_cast %18 : vector<2x8xf32> to vector<2x8x1xf32>
    %20 = vector.broadcast %19 : vector<2x8x1xf32> to vector<2x8x8xf32>
    %21 = arith.subf %17, %20 : vector<2x8x8xf32>
    %22 = math.exp %21 : vector<2x8x8xf32>
    %cst_7 = arith.constant dense<0.000000e+00> : vector<2x8xf32>
    %23 = vector.multi_reduction <add>, %22, %cst_7 [2] : vector<2x8x8xf32> to vector<2x8xf32>
    %24 = vector.shape_cast %23 : vector<2x8xf32> to vector<2x8x1xf32>
    %25 = tpu.reciprocal %24 {approx = true} : vector<2x8x1xf32> -> vector<2x8x1xf32>
    %26 = vector.broadcast %25 : vector<2x8x1xf32> to vector<2x8x8xf32>
    %27 = arith.mulf %22, %26 : vector<2x8x8xf32>
    %28 = arith.truncf %27 : vector<2x8x8xf32> to vector<2x8x8xbf16>
    "tpu.trace_start"() <{level = 10 : i32, message = "bqk,bkd->bqd"}> : () -> ()
    %cst_8 = arith.constant dense<0.000000e+00> : vector<2x8x8xf32>
    %29 = tpu.matmul %28, %12, %cst_8 {dimension_numbers = #tpu.dot_dimension_numbers<[2], [1], [1], [2], [0, 0, 0, 1, 1, 2], [0], [0]>} : vector<2x8x8xbf16>, vector<2x8x8xbf16>, vector<2x8x8xf32> -> vector<2x8x8xf32>
    "tpu.trace_stop"() : () -> ()
    %30 = vector.extract_strided_slice %6 {offsets = [0, 0, 8], sizes = [2, 8, 8], strides = [1, 1, 1]} : vector<2x8x96xbf16> to vector<2x8x8xbf16>
    %31 = vector.extract_strided_slice %6 {offsets = [0, 0, 40], sizes = [2, 8, 8], strides = [1, 1, 1]} : vector<2x8x96xbf16> to vector<2x8x8xbf16>
    %32 = vector.extract_strided_slice %6 {offsets = [0, 0, 72], sizes = [2, 8, 8], strides = [1, 1, 1]} : vector<2x8x96xbf16> to vector<2x8x8xbf16>
    "tpu.trace_start"() <{level = 10 : i32, message = "bqd,bkd->bqk"}> : () -> ()
    %cst_9 = arith.constant dense<0.000000e+00> : vector<2x8x8xf32>
    %33 = tpu.matmul %30, %31, %cst_9 {dimension_numbers = #tpu.dot_dimension_numbers<[2], [2], [1], [1], [0, 0, 0, 1, 1, 1], [0], [0]>} : vector<2x8x8xbf16>, vector<2x8x8xbf16>, vector<2x8x8xf32> -> vector<2x8x8xf32>
    %cst_10 = arith.constant 0xFF800000 : f32
    "tpu.trace_stop"() : () -> ()
    %34 = vector.shape_cast %9 : vector<1x8x8xi1> to vector<1x8x8xi1>
    %35 = vector.broadcast %34 : vector<1x8x8xi1> to vector<2x8x8xi1>
    %36 = vector.broadcast %cst_10 : f32 to vector<2x8x8xf32>
    %37 = arith.select %35, %33, %36 : vector<2x8x8xi1>, vector<2x8x8xf32>
    %cst_11 = arith.constant dense<0xFF800000> : vector<2x8xf32>
    %38 = vector.multi_reduction <maximumf>, %37, %cst_11 [2] : vector<2x8x8xf32> to vector<2x8xf32>
    %39 = vector.shape_cast %38 : vector<2x8xf32> to vector<2x8x1xf32>
    %40 = vector.broadcast %39 : vector<2x8x1xf32> to vector<2x8x8xf32>
    %41 = arith.subf %37, %40 : vector<2x8x8xf32>
    %42 = math.exp %41 : vector<2x8x8xf32>
    %cst_12 = arith.constant dense<0.000000e+00> : vector<2x8xf32>
    %43 = vector.multi_reduction <add>, %42, %cst_12 [2] : vector<2x8x8xf32> to vector<2x8xf32>
    %44 = vector.shape_cast %43 : vector<2x8xf32> to vector<2x8x1xf32>
    %45 = tpu.reciprocal %44 {approx = true} : vector<2x8x1xf32> -> vector<2x8x1xf32>
    %46 = vector.broadcast %45 : vector<2x8x1xf32> to vector<2x8x8xf32>
    %47 = arith.mulf %42, %46 : vector<2x8x8xf32>
    %48 = arith.truncf %47 : vector<2x8x8xf32> to vector<2x8x8xbf16>
    "tpu.trace_start"() <{level = 10 : i32, message = "bqk,bkd->bqd"}> : () -> ()
    %cst_13 = arith.constant dense<0.000000e+00> : vector<2x8x8xf32>
    %49 = tpu.matmul %48, %32, %cst_13 {dimension_numbers = #tpu.dot_dimension_numbers<[2], [1], [1], [2], [0, 0, 0, 1, 1, 2], [0], [0]>} : vector<2x8x8xbf16>, vector<2x8x8xbf16>, vector<2x8x8xf32> -> vector<2x8x8xf32>
    "tpu.trace_stop"() : () -> ()
    %50 = vector.extract_strided_slice %6 {offsets = [0, 0, 16], sizes = [2, 8, 8], strides = [1, 1, 1]} : vector<2x8x96xbf16> to vector<2x8x8xbf16>
    %51 = vector.extract_strided_slice %6 {offsets = [0, 0, 48], sizes = [2, 8, 8], strides = [1, 1, 1]} : vector<2x8x96xbf16> to vector<2x8x8xbf16>
    %52 = vector.extract_strided_slice %6 {offsets = [0, 0, 80], sizes = [2, 8, 8], strides = [1, 1, 1]} : vector<2x8x96xbf16> to vector<2x8x8xbf16>
    "tpu.trace_start"() <{level = 10 : i32, message = "bqd,bkd->bqk"}> : () -> ()
    %cst_14 = arith.constant dense<0.000000e+00> : vector<2x8x8xf32>
    %53 = tpu.matmul %50, %51, %cst_14 {dimension_numbers = #tpu.dot_dimension_numbers<[2], [2], [1], [1], [0, 0, 0, 1, 1, 1], [0], [0]>} : vector<2x8x8xbf16>, vector<2x8x8xbf16>, vector<2x8x8xf32> -> vector<2x8x8xf32>
    %cst_15 = arith.constant 0xFF800000 : f32
    "tpu.trace_stop"() : () -> ()
    %54 = vector.shape_cast %9 : vector<1x8x8xi1> to vector<1x8x8xi1>
    %55 = vector.broadcast %54 : vector<1x8x8xi1> to vector<2x8x8xi1>
    %56 = vector.broadcast %cst_15 : f32 to vector<2x8x8xf32>
    %57 = arith.select %55, %53, %56 : vector<2x8x8xi1>, vector<2x8x8xf32>
    %cst_16 = arith.constant dense<0xFF800000> : vector<2x8xf32>
    %58 = vector.multi_reduction <maximumf>, %57, %cst_16 [2] : vector<2x8x8xf32> to vector<2x8xf32>
    %59 = vector.shape_cast %58 : vector<2x8xf32> to vector<2x8x1xf32>
    %60 = vector.broadcast %59 : vector<2x8x1xf32> to vector<2x8x8xf32>
    %61 = arith.subf %57, %60 : vector<2x8x8xf32>
    %62 = math.exp %61 : vector<2x8x8xf32>
    %cst_17 = arith.constant dense<0.000000e+00> : vector<2x8xf32>
    %63 = vector.multi_reduction <add>, %62, %cst_17 [2] : vector<2x8x8xf32> to vector<2x8xf32>
    %64 = vector.shape_cast %63 : vector<2x8xf32> to vector<2x8x1xf32>
    %65 = tpu.reciprocal %64 {approx = true} : vector<2x8x1xf32> -> vector<2x8x1xf32>
    %66 = vector.broadcast %65 : vector<2x8x1xf32> to vector<2x8x8xf32>
    %67 = arith.mulf %62, %66 : vector<2x8x8xf32>
    %68 = arith.truncf %67 : vector<2x8x8xf32> to vector<2x8x8xbf16>
    "tpu.trace_start"() <{level = 10 : i32, message = "bqk,bkd->bqd"}> : () -> ()
    %cst_18 = arith.constant dense<0.000000e+00> : vector<2x8x8xf32>
    %69 = tpu.matmul %68, %52, %cst_18 {dimension_numbers = #tpu.dot_dimension_numbers<[2], [1], [1], [2], [0, 0, 0, 1, 1, 2], [0], [0]>} : vector<2x8x8xbf16>, vector<2x8x8xbf16>, vector<2x8x8xf32> -> vector<2x8x8xf32>
    "tpu.trace_stop"() : () -> ()
    %70 = vector.extract_strided_slice %6 {offsets = [0, 0, 24], sizes = [2, 8, 8], strides = [1, 1, 1]} : vector<2x8x96xbf16> to vector<2x8x8xbf16>
    %71 = vector.extract_strided_slice %6 {offsets = [0, 0, 56], sizes = [2, 8, 8], strides = [1, 1, 1]} : vector<2x8x96xbf16> to vector<2x8x8xbf16>
    %72 = vector.extract_strided_slice %6 {offsets = [0, 0, 88], sizes = [2, 8, 8], strides = [1, 1, 1]} : vector<2x8x96xbf16> to vector<2x8x8xbf16>
    "tpu.trace_start"() <{level = 10 : i32, message = "bqd,bkd->bqk"}> : () -> ()
    %cst_19 = arith.constant dense<0.000000e+00> : vector<2x8x8xf32>
    %73 = tpu.matmul %70, %71, %cst_19 {dimension_numbers = #tpu.dot_dimension_numbers<[2], [2], [1], [1], [0, 0, 0, 1, 1, 1], [0], [0]>} : vector<2x8x8xbf16>, vector<2x8x8xbf16>, vector<2x8x8xf32> -> vector<2x8x8xf32>
    %cst_20 = arith.constant 0xFF800000 : f32
    "tpu.trace_stop"() : () -> ()
    %74 = vector.shape_cast %9 : vector<1x8x8xi1> to vector<1x8x8xi1>
    %75 = vector.broadcast %74 : vector<1x8x8xi1> to vector<2x8x8xi1>
    %76 = vector.broadcast %cst_20 : f32 to vector<2x8x8xf32>
    %77 = arith.select %75, %73, %76 : vector<2x8x8xi1>, vector<2x8x8xf32>
    %cst_21 = arith.constant dense<0xFF800000> : vector<2x8xf32>
    %78 = vector.multi_reduction <maximumf>, %77, %cst_21 [2] : vector<2x8x8xf32> to vector<2x8xf32>
    %79 = vector.shape_cast %78 : vector<2x8xf32> to vector<2x8x1xf32>
    %80 = vector.broadcast %79 : vector<2x8x1xf32> to vector<2x8x8xf32>
    %81 = arith.subf %77, %80 : vector<2x8x8xf32>
    %82 = math.exp %81 : vector<2x8x8xf32>
    %cst_22 = arith.constant dense<0.000000e+00> : vector<2x8xf32>
    %83 = vector.multi_reduction <add>, %82, %cst_22 [2] : vector<2x8x8xf32> to vector<2x8xf32>
    %84 = vector.shape_cast %83 : vector<2x8xf32> to vector<2x8x1xf32>
    %85 = tpu.reciprocal %84 {approx = true} : vector<2x8x1xf32> -> vector<2x8x1xf32>
    %86 = vector.broadcast %85 : vector<2x8x1xf32> to vector<2x8x8xf32>
    %87 = arith.mulf %82, %86 : vector<2x8x8xf32>
    %88 = arith.truncf %87 : vector<2x8x8xf32> to vector<2x8x8xbf16>
    "tpu.trace_start"() <{level = 10 : i32, message = "bqk,bkd->bqd"}> : () -> ()
    %cst_23 = arith.constant dense<0.000000e+00> : vector<2x8x8xf32>
    %89 = tpu.matmul %88, %72, %cst_23 {dimension_numbers = #tpu.dot_dimension_numbers<[2], [1], [1], [2], [0, 0, 0, 1, 1, 2], [0], [0]>} : vector<2x8x8xbf16>, vector<2x8x8xbf16>, vector<2x8x8xf32> -> vector<2x8x8xf32>
    "tpu.trace_stop"() : () -> ()
    %90 = tpu.concatenate %29, %49, %69, %89 in 2 : vector<2x8x8xf32>, vector<2x8x8xf32>, vector<2x8x8xf32>, vector<2x8x8xf32> -> vector<2x8x32xf32>
    %91 = vector.shape_cast %90 : vector<2x8x32xf32> to vector<16x32xf32>
    %92 = arith.truncf %91 : vector<16x32xf32> to vector<16x32xbf16>
    %c0_24 = arith.constant 0 : index
    %c0_25 = arith.constant 0 : index
    %93 = vector.load %arg3[%c0_24, %c0_25] : memref<32x32xbf16, #tpu.memory_space<vmem>>, vector<32x32xbf16>
    %cst_26 = arith.constant dense<0.000000e+00> : vector<16x32xf32>
    %94 = tpu.matmul %92, %93, %cst_26 {dimension_numbers = #tpu.dot_dimension_numbers<[1], [0], [0], [1], [0, 0, 1, 1], [], []>} : vector<16x32xbf16>, vector<32x32xbf16>, vector<16x32xf32> -> vector<16x32xf32>
    %c0_27 = arith.constant 0 : index
    %c0_28 = arith.constant 0 : index
    %95 = vector.load %arg4[%c0_27, %c0_28] : memref<1x32xf32, #tpu.memory_space<vmem>>, vector<1x32xf32>
    %96 = vector.broadcast %95 : vector<1x32xf32> to vector<16x32xf32>
    %97 = arith.addf %94, %96 : vector<16x32xf32>
    %98 = arith.addf %97, %1 : vector<16x32xf32>
    %c0_29 = arith.constant 0 : index
    %c0_30 = arith.constant 0 : index
    %99 = vector.load %arg5[%c0_29, %c0_30] : memref<1x32xf32, #tpu.memory_space<vmem>>, vector<1x32xf32>
    %c0_31 = arith.constant 0 : index
    %c0_32 = arith.constant 0 : index
    %100 = vector.load %arg6[%c0_31, %c0_32] : memref<1x32xf32, #tpu.memory_space<vmem>>, vector<1x32xf32>
    %cst_33 = arith.constant dense<0.000000e+00> : vector<16xf32>
    %101 = vector.multi_reduction <add>, %98, %cst_33 [1] : vector<16x32xf32> to vector<16xf32>
    %102 = vector.shape_cast %101 : vector<16xf32> to vector<16x1xf32>
    %cst_34 = arith.constant 3.200000e+01 : f32
    %103 = vector.broadcast %cst_34 : f32 to vector<16x1xf32>
    %104 = arith.divf %102, %103 : vector<16x1xf32>
    %105 = vector.broadcast %104 : vector<16x1xf32> to vector<16x32xf32>
    %106 = arith.subf %98, %105 : vector<16x32xf32>
    %107 = arith.mulf %106, %106 : vector<16x32xf32>
    %cst_35 = arith.constant dense<0.000000e+00> : vector<16xf32>
    %108 = vector.multi_reduction <add>, %107, %cst_35 [1] : vector<16x32xf32> to vector<16xf32>
    %109 = vector.shape_cast %108 : vector<16xf32> to vector<16x1xf32>
    %cst_36 = arith.constant 3.200000e+01 : f32
    %110 = vector.broadcast %cst_36 : f32 to vector<16x1xf32>
    %111 = arith.divf %109, %110 : vector<16x1xf32>
    %112 = vector.broadcast %104 : vector<16x1xf32> to vector<16x32xf32>
    %113 = arith.subf %98, %112 : vector<16x32xf32>
    %cst_37 = arith.constant 9.99999974E-6 : f32
    %114 = vector.broadcast %cst_37 : f32 to vector<16x1xf32>
    %115 = arith.addf %111, %114 : vector<16x1xf32>
    %116 = math.rsqrt %115 : vector<16x1xf32>
    %117 = vector.broadcast %116 : vector<16x1xf32> to vector<16x32xf32>
    %118 = arith.mulf %113, %117 : vector<16x32xf32>
    %119 = vector.broadcast %99 : vector<1x32xf32> to vector<16x32xf32>
    %120 = arith.mulf %118, %119 : vector<16x32xf32>
    %121 = vector.broadcast %100 : vector<1x32xf32> to vector<16x32xf32>
    %122 = arith.addf %120, %121 : vector<16x32xf32>
    %123 = arith.truncf %122 : vector<16x32xf32> to vector<16x32xbf16>
    %c0_38 = arith.constant 0 : index
    %c0_39 = arith.constant 0 : index
    %124 = vector.load %arg7[%c0_38, %c0_39] : memref<32x128xbf16, #tpu.memory_space<vmem>>, vector<32x128xbf16>
    %cst_40 = arith.constant dense<0.000000e+00> : vector<16x128xf32>
    %125 = tpu.matmul %123, %124, %cst_40 {dimension_numbers = #tpu.dot_dimension_numbers<[1], [0], [0], [1], [0, 0, 1, 1], [], []>} : vector<16x32xbf16>, vector<32x128xbf16>, vector<16x128xf32> -> vector<16x128xf32>
    %c0_41 = arith.constant 0 : index
    %c0_42 = arith.constant 0 : index
    %126 = vector.load %arg8[%c0_41, %c0_42] : memref<1x128xf32, #tpu.memory_space<vmem>>, vector<1x128xf32>
    %127 = vector.broadcast %126 : vector<1x128xf32> to vector<16x128xf32>
    %128 = arith.addf %125, %127 : vector<16x128xf32>
    %cst_43 = arith.constant 5.000000e-01 : f32
    %129 = vector.broadcast %cst_43 : f32 to vector<16x128xf32>
    %130 = arith.mulf %129, %128 : vector<16x128xf32>
    %cst_44 = arith.constant 0.707106769 : f32
    %131 = vector.broadcast %cst_44 : f32 to vector<16x128xf32>
    %132 = arith.mulf %128, %131 : vector<16x128xf32>
    %133 = math.erf %132 : vector<16x128xf32>
    %cst_45 = arith.constant 1.000000e+00 : f32
    %134 = vector.broadcast %cst_45 : f32 to vector<16x128xf32>
    %135 = arith.addf %134, %133 : vector<16x128xf32>
    %136 = arith.mulf %130, %135 : vector<16x128xf32>
    %137 = arith.truncf %136 : vector<16x128xf32> to vector<16x128xbf16>
    %c0_46 = arith.constant 0 : index
    %c0_47 = arith.constant 0 : index
    %138 = vector.load %arg9[%c0_46, %c0_47] : memref<128x32xbf16, #tpu.memory_space<vmem>>, vector<128x32xbf16>
    %cst_48 = arith.constant dense<0.000000e+00> : vector<16x32xf32>
    %139 = tpu.matmul %137, %138, %cst_48 {dimension_numbers = #tpu.dot_dimension_numbers<[1], [0], [0], [1], [0, 0, 1, 1], [], []>} : vector<16x128xbf16>, vector<128x32xbf16>, vector<16x32xf32> -> vector<16x32xf32>
    %c0_49 = arith.constant 0 : index
    %c0_50 = arith.constant 0 : index
    %140 = vector.load %arg10[%c0_49, %c0_50] : memref<1x32xf32, #tpu.memory_space<vmem>>, vector<1x32xf32>
    %141 = vector.broadcast %140 : vector<1x32xf32> to vector<16x32xf32>
    %142 = arith.addf %139, %141 : vector<16x32xf32>
    %143 = arith.addf %142, %122 : vector<16x32xf32>
    %c0_51 = arith.constant 0 : index
    %c0_52 = arith.constant 0 : index
    %144 = vector.load %arg11[%c0_51, %c0_52] : memref<1x32xf32, #tpu.memory_space<vmem>>, vector<1x32xf32>
    %c0_53 = arith.constant 0 : index
    %c0_54 = arith.constant 0 : index
    %145 = vector.load %arg12[%c0_53, %c0_54] : memref<1x32xf32, #tpu.memory_space<vmem>>, vector<1x32xf32>
    %cst_55 = arith.constant dense<0.000000e+00> : vector<16xf32>
    %146 = vector.multi_reduction <add>, %143, %cst_55 [1] : vector<16x32xf32> to vector<16xf32>
    %147 = vector.shape_cast %146 : vector<16xf32> to vector<16x1xf32>
    %cst_56 = arith.constant 3.200000e+01 : f32
    %148 = vector.broadcast %cst_56 : f32 to vector<16x1xf32>
    %149 = arith.divf %147, %148 : vector<16x1xf32>
    %150 = vector.broadcast %149 : vector<16x1xf32> to vector<16x32xf32>
    %151 = arith.subf %143, %150 : vector<16x32xf32>
    %152 = arith.mulf %151, %151 : vector<16x32xf32>
    %cst_57 = arith.constant dense<0.000000e+00> : vector<16xf32>
    %153 = vector.multi_reduction <add>, %152, %cst_57 [1] : vector<16x32xf32> to vector<16xf32>
    %154 = vector.shape_cast %153 : vector<16xf32> to vector<16x1xf32>
    %cst_58 = arith.constant 3.200000e+01 : f32
    %155 = vector.broadcast %cst_58 : f32 to vector<16x1xf32>
    %156 = arith.divf %154, %155 : vector<16x1xf32>
    %157 = vector.broadcast %149 : vector<16x1xf32> to vector<16x32xf32>
    %158 = arith.subf %143, %157 : vector<16x32xf32>
    %cst_59 = arith.constant 9.99999974E-6 : f32
    %159 = vector.broadcast %cst_59 : f32 to vector<16x1xf32>
    %160 = arith.addf %156, %159 : vector<16x1xf32>
    %161 = math.rsqrt %160 : vector<16x1xf32>
    %162 = vector.broadcast %161 : vector<16x1xf32> to vector<16x32xf32>
    %163 = arith.mulf %158, %162 : vector<16x32xf32>
    %164 = vector.broadcast %144 : vector<1x32xf32> to vector<16x32xf32>
    %165 = arith.mulf %163, %164 : vector<16x32xf32>
    %166 = vector.broadcast %145 : vector<1x32xf32> to vector<16x32xf32>
    %167 = arith.addf %165, %166 : vector<16x32xf32>
    %168 = vector.shape_cast %167 : vector<16x32xf32> to vector<2x8x32xf32>
    %c0_60 = arith.constant 0 : index
    %c0_61 = arith.constant 0 : index
    %c0_62 = arith.constant 0 : index
    %169 = vector.load %arg13[%c0_60, %c0_61, %c0_62] : memref<2x8x32xf32, #tpu.memory_space<vmem>>, vector<2x8x32xf32>
    tpu.vector_store %arg13[%c0_60, %c0_61, %c0_62], %168 {strides = array<i32>} : memref<2x8x32xf32, #tpu.memory_space<vmem>>, vector<2x8x32xf32>,
    return
  }
  func.func @transform_0(%arg0: i32) -> (i32, i32, i32) {
    %c0_i32 = arith.constant 0 : i32
    %c0_i32_0 = arith.constant 0 : i32
    %c0_i32_1 = arith.constant 0 : i32
    return %arg0, %c0_i32, %c0_i32_0 : i32, i32, i32
  }
  func.func @transform_1(%arg0: i32) -> (i32, i32) {
    %c0_i32 = arith.constant 0 : i32
    %c0_i32_0 = arith.constant 0 : i32
    %c0_i32_1 = arith.constant 0 : i32
    return %c0_i32, %c0_i32_0 : i32, i32
  }
  func.func @transform_2(%arg0: i32) -> (i32, i32) {
    %c0_i32 = arith.constant 0 : i32
    %c0_i32_0 = arith.constant 0 : i32
    %c0_i32_1 = arith.constant 0 : i32
    return %c0_i32, %c0_i32_0 : i32, i32
  }
  func.func @transform_3(%arg0: i32) -> (i32, i32) {
    %c0_i32 = arith.constant 0 : i32
    %c0_i32_0 = arith.constant 0 : i32
    %c0_i32_1 = arith.constant 0 : i32
    return %c0_i32, %c0_i32_0 : i32, i32
  }
  func.func @transform_4(%arg0: i32) -> (i32, i32) {
    %c0_i32 = arith.constant 0 : i32
    %c0_i32_0 = arith.constant 0 : i32
    %c0_i32_1 = arith.constant 0 : i32
    return %c0_i32, %c0_i32_0 : i32, i32
  }
  func.func @transform_5(%arg0: i32) -> (i32, i32) {
    %c0_i32 = arith.constant 0 : i32
    %c0_i32_0 = arith.constant 0 : i32
    %c0_i32_1 = arith.constant 0 : i32
    return %c0_i32, %c0_i32_0 : i32, i32
  }
  func.func @transform_6(%arg0: i32) -> (i32, i32) {
    %c0_i32 = arith.constant 0 : i32
    %c0_i32_0 = arith.constant 0 : i32
    %c0_i32_1 = arith.constant 0 : i32
    return %c0_i32, %c0_i32_0 : i32, i32
  }
  func.func @transform_7(%arg0: i32) -> (i32, i32) {
    %c0_i32 = arith.constant 0 : i32
    %c0_i32_0 = arith.constant 0 : i32
    %c0_i32_1 = arith.constant 0 : i32
    return %c0_i32, %c0_i32_0 : i32, i32
  }
  func.func @transform_8(%arg0: i32) -> (i32, i32) {
    %c0_i32 = arith.constant 0 : i32
    %c0_i32_0 = arith.constant 0 : i32
    %c0_i32_1 = arith.constant 0 : i32
    return %c0_i32, %c0_i32_0 : i32, i32
  }
  func.func @transform_9(%arg0: i32) -> (i32, i32) {
    %c0_i32 = arith.constant 0 : i32
    %c0_i32_0 = arith.constant 0 : i32
    %c0_i32_1 = arith.constant 0 : i32
    return %c0_i32, %c0_i32_0 : i32, i32
  }
  func.func @transform_10(%arg0: i32) -> (i32, i32) {
    %c0_i32 = arith.constant 0 : i32
    %c0_i32_0 = arith.constant 0 : i32
    %c0_i32_1 = arith.constant 0 : i32
    return %c0_i32, %c0_i32_0 : i32, i32
  }
  func.func @transform_11(%arg0: i32) -> (i32, i32) {
    %c0_i32 = arith.constant 0 : i32
    %c0_i32_0 = arith.constant 0 : i32
    %c0_i32_1 = arith.constant 0 : i32
    return %c0_i32, %c0_i32_0 : i32, i32
  }
  func.func @transform_12(%arg0: i32) -> (i32, i32, i32) {
    %c0_i32 = arith.constant 0 : i32
    %c0_i32_0 = arith.constant 0 : i32
    %c0_i32_1 = arith.constant 0 : i32
    return %arg0, %c0_i32, %c0_i32_0 : i32, i32, i32
  }
}

</mosaic_0001>

<bundles_post_ra>
// kernel: tpu_custom_call.1
= control target key start
LH: loop header
LB: loop body
LE: loop exit
PB: predicated region body
PF: predicated region fallthrough
CT: control target
= control target key end

     0   :  { %s2732_s0 = inlined_call_operand.vmem [shape: f32[4,8,32], index: 0, kind: input, shape index: {}]   ;;  %s2733_s1 = inlined_call_operand.vmem [shape: bf16[32,96], index: 1, kind: input, shape index: {}]   ;;  %s2734_s2 = inlined_call_operand.vmem [shape: bf16[32,32], index: 2, kind: input, shape index: {}]   ;;  %s2735_s3 = inlined_call_operand.vmem [shape: f32[1,32], index: 3, kind: input, shape index: {}]   ;;  %s2736_s4 = inlined_call_operand.vmem [shape: f32[1,32], index: 4, kind: input, shape index: {}]   ;;  %s2737_s5 = inlined_call_operand.vmem [shape: f32[1,32], index: 5, kind: input, shape index: {}]   ;;  %s2738_s6 = inlined_call_operand.vmem [shape: bf16[32,128], index: 6, kind: input, shape index: {}]   ;;  %s2739_s7 = inlined_call_operand.vmem [shape: f32[1,128], index: 7, kind: input, shape index: {}]   ;;  %s2740_s8 = inlined_call_operand.vmem [shape: bf16[128,32], index: 8, kind: input, shape index: {}]   ;;  %s2741_s9 = inlined_call_operand.vmem [shape: f32[1,32], index: 9, kind: input, shape index: {}]   ;;  %s2742_s10 = inlined_call_operand.vmem [shape: f32[1,32], index: 10, kind: input, shape index: {}]   ;;  %s2743_s11 = inlined_call_operand.vmem [shape: f32[1,32], index: 11, kind: input, shape index: {}]   ;;  %s2744_s12 = inlined_call_operand.hbm [shape: f32[4,8,32], index: 12, kind: output, shape index: {}]  }
   0x1   :  { %2746 = sst [smem:[#allocation5_spill]] %s2732_s0 }
   0x2   :  { %2747 = sst [smem:[#allocation6_spill]] %s2733_s1 }
   0x3   :  { %17 = vsyncpa [#allocation3], 0 }
   0x4   :  { %19 = vsyncpa [#allocation3 + $0x1], 0  ;;  %s2362_s21 = smov 0   ;;  %s2364_s22 = smov 0  }
   0x5   :  { %s2366_s23 = smov 0   ;;  %s2368_s24 = smov 0  }
   0x6 LB: > { %s2383_s25 = sadd.s32 4294967295, %s2277_s24   ;;  %s1841_s26 = sadd.s32 4294967294, %s2277_s24   ;;  %s2277_s24 = sphi %s2368_s24, %s2758_s24   ;;  %s2273_s23 = sphi %s2366_s23, %s2757_s23   ;;  %s2269_s22 = sphi %s2364_s22, %s2756_s22   ;;  %s2265_s21 = sphi %s2362_s21, %s2755_s21  }
   0x7   : > { %s2387_s27 = sadd.s32 1, %s2277_s24   ;;  %s289_s28 = sadd.s32 1, %s2273_s23 }
   0x8   : > { %s286_s29 = ssub.s32 %s2277_s24, %s2387_s27  ;;  %p299_p0 = scmp.ne.s32.totalorder %s2273_s23, %s2269_s22 }
   0x9   : > { %p287_p1 = scmp.eq.s32.totalorder %s286_s29, 0  ;;  %p300_p2 = scmp.eq.s32.totalorder %s2383_s25, 1 }
   0xa   : > { %p305_p3 = scmp.ne.s32.totalorder %s2269_s22, %s2265_s21  ;;  %p306_p4 = scmp.eq.s32.totalorder %s1841_s26, 1 }
   0xb   : > { %s2398_s30 = scalar_select %p287_p1, %s2273_s23, %s289_s28  }
   0xc   : > { %p2400_p5 = por %p300_p2, %p299_p0  ;;  %p2404_p6 = por %p306_p4, %p305_p3 }
   0xd   : > { %p1844_p7 = scmp.ge.s32.totalorder %s2277_s24, 1  ;;  %p366_p8 = scmp.lt.s32.totalorder %s2277_s24, 3 }
   0xf   : > { %p367_p9 = pnand %p1844_p7, %p366_p8 }
  0x10   : > { %s2750_s1 = sld [smem:[#allocation6_spill]] (!%p367_p9)  ;;  %s1846_s19 = sshll.u32 (!%p367_p9), %s2383_s25, 1 }
  0x11   : > { %370 = sbr.rel (%p367_p9) target bundleno = 3983 (0xf8f), region = 68  ;;  %p409_p10 = scmp.lt.s32.totalorder (!%p367_p9), %s1846_s19, 3 }
  0x12   : > { %s2751_s0 = sld [smem:[#allocation5_spill]] (!%p367_p9)  ;;  %s2281_s15 = smov (!%p367_p9), 96  }
  0x13   : > { %s2282_s16 = smov (!%p367_p9), 64   ;;  %s2283_s17 = smov (!%p367_p9), 88  }
  0x14   : > { %s2284_s18 = smov (!%p367_p9), 120   ;;  %s2287_s26 = smov (!%p367_p9), 112  }
  0x15   : > { %s2288_s28 = smov (!%p367_p9), 48  }
  0x16   : > { %v2159_v0 = vld [vmem:[%s2750_s1 + $0x8] sm:$0xff]   ;;  %v2279_v1 = vmov 0.0   ;;  %v2160_v2 = vld [vmem:[%s2750_s1] sm:$0xff]   ;;  %vm2280_vm0 = vmmov 0   ;;  %s2760_s19 = smov (!%p409_p10, %s1846_s19), 3  ;;  %vm435_vm1 = vcmask 261120   ;;  %v486_v16 = vlaneseq }
  0x17   : > { %1948 = vmatprep.subr.bf16.mxu0 %v2279_v1  ;;  %1968 = vmatprep.subr.bf16.mxu1 %v2279_v1  ;;  %s1847_s20 = sshll.u32 %s2760_s19, 3  ;;  %vm493_vm2 = vcmask 64512   ;;  %vm621_vm4 = vcmask 1043456   ;;  %s2285_s19 = smov 56   ;;  %vm1405_vm5 = vcmask 130048   ;;  %vm1408_vm6 = vcmask 195584  }
  0x18   : > { %1949 = vmatpush3.bf16.msra.mxu0 %v2159_v0  ;;  %1952 = vmatprep.mubr.msk.bf16.mxu0 %vm2280_vm0, %v2279_v1  ;;  %s412_s29 = scalar_lea.vmem %s2751_s0, %s1847_s20  ;;  %v487_v17 = vshrl.u32 %v486_v16, 7  ;;  %v489_v18 = vand.u32 127, %v486_v16  ;;  %s2286_s20 = smov 80  }
  0x19   : > { %1950 = vmatprep.subr.bf16.mxu0 %v2279_v1  ;;  %1970 = vmatprep.mubr.msk.bf16.mxu1 %vm2280_vm0, %v2279_v1  ;;  %v2428_v3 = vld [vmem:[%s412_s29] sm:$0xff]  ;;  %v2430_v4 = vld [vmem:[%s412_s29 + $0x8] sm:$0xff]  ;;  %s2289_s29 = smov 72  }
  0x1a   : > { %v418_v5 = vpack.c.bf16 %v2430_v4, %v2428_v3  ;;  %vm2455_vm3 = vcmp.le.s32.totalorder %v489_v18, %v487_v17 }
  0x1c   : > { %1951 = vmatpush3.bf16.msra.mxu0 %v2160_v2 }
  0x1d   : > { %1956 = vmatprep.subr.bf16.mxu0 %v2279_v1 }
  0x1f   : > { %1953 = vmatmul.mubr.msk.bf16.vlgmr.msra.gmra.mxu0 %vm435_vm1, %v418_v5 }
  0x20   : > { %1958 = vmatprep.mubr.msk.bf16.mxu0 %vm2280_vm0, %v2279_v1 }
  0xdf   : > { %v473_v6 = vpop.f32.mrf.mxu0 }
  0xe0   : > { %v2437_v7 = vpack.c.bf16 %v473_v6, %v473_v6 }
  0xe1   : > { %v1954_v8 = vpop.f32.mrf.mxu0 }
  0xe2   : > { %491 = vrot.lane.b32.xlu0 %v2437_v7, %s2281_s15 }
  0xe3   : > { %v476_v9 = vpop.f32.mrf.mxu0 }
  0xe4   : > { %v2440_v10 = vpack.c.bf16 %v476_v9, %v476_v9 }
  0xe5   : > { %v1955_v11 = vpop.f32.mrf.mxu0 }
  0xe6   : > { %540 = vrot.lane.b32.xlu0 %v2440_v10, %s2281_s15  ;;  %s2290_s15 = smov 104  }
 0x154   : > { %v492_v12 = vpop.permute.xlu0 %491 }
 0x155   : > { %v498_v13 = vsel %vm493_vm2, %v492_v12, 0 }
 0x156   : > { %1957 = vmatpush3.bf16.xpose.msra.mxu0 %v498_v13 }
 0x157   : > { %1962 = vmatprep.subr.bf16.mxu0 %v2279_v1 }
 0x158   : > { %v541_v14 = vpop.permute.xlu0 %540 }
 0x159   : > { %v546_v15 = vsel %vm493_vm2, %v541_v14, 0 }
 0x15d   : > { %1959 = vmatmul.mubr.msk.bf16.vlgmr.msra.gmra.mxu0 %vm493_vm2, %v2437_v7 }
 0x15e   : > { %1963 = vmatpush3.bf16.xpose.msra.mxu0 %v546_v15  ;;  %1964 = vmatprep.mubr.msk.bf16.mxu0 %vm2280_vm0, %v2279_v1 }
 0x15f   : > { %1974 = vmatprep.subr.bf16.mxu0 %v2279_v1 }
 0x165   : > { %1965 = vmatmul.mubr.msk.bf16.vlgmr.msra.gmra.mxu0 %vm493_vm2, %v2440_v10 }
 0x166   : > { %1976 = vmatprep.mubr.msk.bf16.mxu0 %vm2280_vm0, %v2279_v1 }
 0x21d   : > { %v534_v20 = vpop.f32.mrf.mxu0 }
 0x21e   : > { %v590_v21 = vsel %vm2455_vm3, %v534_v20, -inf }
 0x21f   : > { %v1960_v22 = vpop.f32.mrf.mxu0  ;;  %v592_v23 = vsel %vm493_vm2, %v590_v21, -inf }
 0x220   : > { %593 = vmax.xlane.f32.xlu1 %v592_v23 }
 0x221   : > { %v537_v24 = vpop.f32.mrf.mxu0 }
 0x223   : > { %v1961_v25 = vpop.f32.mrf.mxu0 }
 0x225   : > { %v582_v26 = vpop.f32.mrf.mxu0 }
 0x226   : > { %v591_v27 = vsel %vm2455_vm3, %v582_v26, -inf }
 0x227   : > { %v1966_v28 = vpop.f32.mrf.mxu0  ;;  %v595_v29 = vsel %vm493_vm2, %v591_v27, -inf }
 0x228   : > { %596 = vmax.xlane.f32.xlu1 %v595_v29 }
 0x229   : > { %v585_v30 = vpop.f32.mrf.mxu0 }
 0x22b   : > { %v1967_v31 = vpop.f32.mrf.mxu0 }
 0x239   : > { %616 = vrot.lane.b32.xlu1 %v2437_v7, %s2282_s16 }
 0x23d   : > { %665 = vrot.lane.b32.xlu1 %v2440_v10, %s2282_s16  ;;  %s2291_s16 = smov 40  }
 0x241   : > { %715 = vrot.lane.b32.xlu1 %v2437_v7, %s2283_s17 }
 0x2a9   : > { %v594_v32 = vpop.xlane.xlu1 %593 }
 0x2aa   : > { %v598_v33 = vsub.f32 %v590_v21, %v594_v32 }
 0x2ac   : > { %v600_v34 = vmul.f32 1.442695, %v598_v33 }
 0x2ae   : > { %2173 = vpow2.f32 %v600_v34 }
 0x2b1   : > { %v597_v35 = vpop.xlane.xlu1 %596 }
 0x2b2   : > { %v599_v36 = vsub.f32 %v591_v27, %v597_v35 }
 0x2b4   : > { %v602_v37 = vmul.f32 1.442695, %v599_v36 }
 0x2b5   : > { %v617_v38 = vpop.permute.xlu1 %616 }
 0x2b6   : > { %2175 = vpow2.f32 %v602_v37  ;;  %v623_v39 = vsel %vm621_vm4, %v617_v38, 0 }
 0x2b7   : > { %1969 = vmatpush3.bf16.msra.mxu1 %v623_v39 }
 0x2b8   : > { %1980 = vmatprep.subr.bf16.mxu1 %v2279_v1 }
 0x2b9   : > { %v666_v40 = vpop.permute.xlu1 %665 }
 0x2ba   : > { %v671_v41 = vsel %vm621_vm4, %v666_v40, 0 }
 0x2bb   : > { %v2174_v42 = vpop.eup %2173  ;;  %1975 = vmatpush3.bf16.msra.mxu0 %v671_v41 }
 0x2bc   : > { %v604_v43 = vsel %vm493_vm2, %v2174_v42, 0.0  ;;  %1986 = vmatprep.subr.bf16.mxu0 %v2279_v1 }
 0x2bd   : > { %605 = vadd.xlane.f32.xlu0 %v604_v43  ;;  %v716_v47 = vpop.permute.xlu1 %715 }
 0x2be   : > { %v721_v52 = vsel %vm493_vm2, %v716_v47, 0 }
 0x2c3   : > { %v2176_v44 = vpop.eup %2175 }
 0x2c4   : > { %v607_v45 = vsel %vm493_vm2, %v2176_v44, 0.0 }
 0x2c5   : > { %608 = vadd.xlane.f32.xlu1 %v607_v45 }
 0x2d3   : > { %713 = vrot.lane.b32.xlu0 %v2437_v7, %s2284_s18 }
 0x2d6   : > { %765 = vrot.lane.b32.xlu1 %v2440_v10, %s2283_s17  ;;  %s2745_s17 = smov 8  }
 0x2da   : > { %763 = vrot.lane.b32.xlu1 %v2440_v10, %s2284_s18  ;;  %s2293_s18 = smov 16  }
 0x346   : > { %v606_v46 = vpop.xlane.xlu0 %605 }
 0x347   : > { %2177 = vrcp.f32 %v606_v46 }
 0x34a   : > { %v714_v57 = vpop.permute.xlu0 %713 }
 0x34e   : > { %v609_v48 = vpop.xlane.xlu1 %608 }
 0x34f   : > { %2179 = vrcp.f32 %v609_v48 }
 0x352   : > { %v766_v55 = vpop.permute.xlu1 %765 }
 0x353   : > { %v771_v58 = vsel %vm493_vm2, %v766_v55, 0 }
 0x354   : > { %v2178_v49 = vpop.eup %2177 }
 0x355   : > { %v612_v50 = vmul.f32 %v2178_v49, %v2174_v42 }
 0x356   : > { %v764_v59 = vpop.permute.xlu1 %763 }
 0x357   : > { %v614_v51 = vpack.c.bf16 %v612_v50, %v612_v50 }
 0x359   : > { %1971 = vmatmul.mubr.msk.bf16.vlgmr.msra.gmra.mxu1 %vm493_vm2, %v614_v51 }
 0x35a   : > { %1981 = vmatpush3.bf16.xpose.msra.mxu1 %v721_v52  ;;  %1982 = vmatprep.mubr.msk.bf16.mxu1 %vm2280_vm0, %v2279_v1 }
 0x35b   : > { %1992 = vmatprep.subr.bf16.mxu1 %v2279_v1 }
 0x35c   : > { %v2180_v53 = vpop.eup %2179 }
 0x35d   : > { %v613_v54 = vmul.f32 %v2180_v53, %v2176_v44 }
 0x35f   : > { %v615_v56 = vpack.c.bf16 %v613_v54, %v613_v54 }
 0x361   : > { %1977 = vmatmul.mubr.msk.bf16.vlgmr.msra.gmra.mxu0 %vm493_vm2, %v615_v56  ;;  %1983 = vmatmul.mubr.msk.bf16.vlgmr.msra.gmra.mxu1 %vm493_vm2, %v714_v57 }
 0x362   : > { %1987 = vmatpush3.bf16.xpose.msra.mxu0 %v771_v58  ;;  %1988 = vmatprep.mubr.msk.bf16.mxu0 %vm2280_vm0, %v2279_v1 }
 0x363   : > { %1998 = vmatprep.subr.bf16.mxu0 %v2279_v1  ;;  %1994 = vmatprep.mubr.msk.bf16.mxu1 %vm2280_vm0, %v2279_v1 }
 0x369   : > { %1989 = vmatmul.mubr.msk.bf16.vlgmr.msra.gmra.mxu0 %vm493_vm2, %v764_v59 }
 0x36a   : > { %2000 = vmatprep.mubr.msk.bf16.mxu0 %vm2280_vm0, %v2279_v1 }
 0x419   : > { %v2493_v60 = vpop.f32.mrf.mxu1 }
 0x41b   : > { %v1972_v61 = vpop.f32.mrf.mxu1 }
 0x41d   : > { %v662_v62 = vpop.f32.mrf.mxu1 }
 0x41f   : > { %v1973_v63 = vpop.f32.mrf.mxu1 }
 0x421   : > { %v2495_v0 = vpop.f32.mrf.mxu0  ;;  %v757_v2 = vpop.f32.mrf.mxu1 }
 0x422   : > { %v813_v5 = vsel %vm2455_vm3, %v757_v2, -inf }
 0x423   : > { %v1978_v6 = vpop.f32.mrf.mxu0  ;;  %v1984_v8 = vpop.f32.mrf.mxu1  ;;  %v815_v9 = vsel %vm493_vm2, %v813_v5, -inf }
 0x424   : > { %816 = vmax.xlane.f32.xlu1 %v815_v9 }
 0x425   : > { %v710_v11 = vpop.f32.mrf.mxu0  ;;  %v760_v12 = vpop.f32.mrf.mxu1 }
 0x427   : > { %v1979_v13 = vpop.f32.mrf.mxu0  ;;  %v1985_v14 = vpop.f32.mrf.mxu1 }
 0x429   : > { %v807_v15 = vpop.f32.mrf.mxu0 }
 0x42a   : > { %v814_v16 = vsel %vm2455_vm3, %v807_v15, -inf }
 0x42b   : > { %v1990_v17 = vpop.f32.mrf.mxu0  ;;  %v818_v18 = vsel %vm493_vm2, %v814_v16, -inf }
 0x42c   : > { %819 = vmax.xlane.f32.xlu0 %v818_v18 }
 0x42d   : > { %v810_v20 = vpop.f32.mrf.mxu0 }
 0x42f   : > { %v1991_v21 = vpop.f32.mrf.mxu0 }
 0x435   : > { %839 = vrot.lane.b32.xlu1 %v2437_v7, %s2285_s19 }
 0x439   : > { %937 = vrot.lane.b32.xlu1 %v2437_v7, %s2286_s20 }
 0x442   : > { %887 = vrot.lane.b32.xlu0 %v2440_v10, %s2285_s19 }
 0x446   : > { %935 = vrot.lane.b32.xlu0 %v2437_v7, %s2287_s26 }
 0x4ad   : > { %v817_v22 = vpop.xlane.xlu1 %816 }
 0x4ae   : > { %v821_v23 = vsub.f32 %v813_v5, %v817_v22 }
 0x4b0   : > { %v823_v24 = vmul.f32 1.442695, %v821_v23 }
 0x4b1   : > { %v840_v25 = vpop.permute.xlu1 %839 }
 0x4b2   : > { %2181 = vpow2.f32 %v823_v24  ;;  %v845_v26 = vsel %vm621_vm4, %v840_v25, 0 }
 0x4b3   : > { %1993 = vmatpush3.bf16.msra.mxu1 %v845_v26 }
 0x4b4   : > { %2004 = vmatprep.subr.bf16.mxu1 %v2279_v1 }
 0x4b5   : > { %v820_v27 = vpop.xlane.xlu0 %819  ;;  %v938_v36 = vpop.permute.xlu1 %937 }
 0x4b6   : > { %v822_v28 = vsub.f32 %v814_v16, %v820_v27  ;;  %v943_v42 = vsel %vm493_vm2, %v938_v36, 0 }
 0x4b8   : > { %v825_v29 = vmul.f32 1.442695, %v822_v28 }
 0x4b9   : > { %v888_v30 = vpop.permute.xlu0 %887 }
 0x4ba   : > { %2183 = vpow2.f32 %v825_v29  ;;  %v893_v31 = vsel %vm621_vm4, %v888_v30, 0 }
 0x4bb   : > { %1999 = vmatpush3.bf16.msra.mxu0 %v893_v31 }
 0x4bc   : > { %2010 = vmatprep.subr.bf16.mxu0 %v2279_v1 }
 0x4bd   : > { %v936_v47 = vpop.permute.xlu0 %935 }
 0x4bf   : > { %v2182_v32 = vpop.eup %2181 }
 0x4c0   : > { %v827_v33 = vsel %vm493_vm2, %v2182_v32, 0.0 }
 0x4c1   : > { %828 = vadd.xlane.f32.xlu1 %v827_v33 }
 0x4c7   : > { %v2184_v34 = vpop.eup %2183 }
 0x4c8   : > { %v830_v35 = vsel %vm493_vm2, %v2184_v34, 0.0 }
 0x4c9   : > { %831 = vadd.xlane.f32.xlu1 %v830_v35 }
 0x4da   : > { %987 = vrot.lane.b32.xlu1 %v2440_v10, %s2286_s20  ;;  %s1897_s20 = sshll.u32 %s2383_s25, 8 }
 0x4de   : > { %985 = vrot.lane.b32.xlu1 %v2440_v10, %s2287_s26 }
 0x54a   : > { %v829_v37 = vpop.xlane.xlu1 %828 }
 0x54b   : > { %2185 = vrcp.f32 %v829_v37 }
 0x552   : > { %v832_v38 = vpop.xlane.xlu1 %831 }
 0x553   : > { %2187 = vrcp.f32 %v832_v38 }
 0x556   : > { %v988_v45 = vpop.permute.xlu1 %987 }
 0x557   : > { %v993_v48 = vsel %vm493_vm2, %v988_v45, 0 }
 0x558   : > { %v2186_v39 = vpop.eup %2185 }
 0x559   : > { %v835_v40 = vmul.f32 %v2186_v39, %v2182_v32 }
 0x55a   : > { %v986_v49 = vpop.permute.xlu1 %985 }
 0x55b   : > { %v837_v41 = vpack.c.bf16 %v835_v40, %v835_v40 }
 0x55d   : > { %1995 = vmatmul.mubr.msk.bf16.vlgmr.msra.gmra.mxu1 %vm493_vm2, %v837_v41 }
 0x55e   : > { %2005 = vmatpush3.bf16.xpose.msra.mxu1 %v943_v42  ;;  %2006 = vmatprep.mubr.msk.bf16.mxu1 %vm2280_vm0, %v2279_v1 }
 0x55f   : > { %2016 = vmatprep.subr.bf16.mxu1 %v2279_v1 }
 0x560   : > { %v2188_v43 = vpop.eup %2187 }
 0x561   : > { %v836_v44 = vmul.f32 %v2188_v43, %v2184_v34 }
 0x563   : > { %v838_v46 = vpack.c.bf16 %v836_v44, %v836_v44 }
 0x565   : > { %2001 = vmatmul.mubr.msk.bf16.vlgmr.msra.gmra.mxu0 %vm493_vm2, %v838_v46  ;;  %2007 = vmatmul.mubr.msk.bf16.vlgmr.msra.gmra.mxu1 %vm493_vm2, %v936_v47 }
 0x566   : > { %2011 = vmatpush3.bf16.xpose.msra.mxu0 %v993_v48  ;;  %2012 = vmatprep.mubr.msk.bf16.mxu0 %vm2280_vm0, %v2279_v1 }
 0x567   : > { %2022 = vmatprep.subr.bf16.mxu0 %v2279_v1  ;;  %2018 = vmatprep.mubr.msk.bf16.mxu1 %vm2280_vm0, %v2279_v1 }
 0x56d   : > { %2013 = vmatmul.mubr.msk.bf16.vlgmr.msra.gmra.mxu0 %vm493_vm2, %v986_v49 }
 0x56e   : > { %2024 = vmatprep.mubr.msk.bf16.mxu0 %vm2280_vm0, %v2279_v1 }
 0x61d   : > { %v2531_v50 = vpop.f32.mrf.mxu1 }
 0x61f   : > { %v1996_v51 = vpop.f32.mrf.mxu1 }
 0x621   : > { %v884_v52 = vpop.f32.mrf.mxu1 }
 0x623   : > { %v1997_v53 = vpop.f32.mrf.mxu1 }
 0x625   : > { %v2533_v54 = vpop.f32.mrf.mxu0  ;;  %v979_v55 = vpop.f32.mrf.mxu1 }
 0x626   : > { %v2144_v56 = vpack.i.bf16 %v2533_v54, %v2531_v50  ;;  %v1035_v57 = vsel %vm2455_vm3, %v979_v55, -inf }
 0x627   : > { %v2002_v58 = vpop.f32.mrf.mxu0  ;;  %v2008_v59 = vpop.f32.mrf.mxu1  ;;  %v1037_v61 = vsel %vm493_vm2, %v1035_v57, -inf }
 0x628   : > { %1038 = vmax.xlane.f32.xlu0 %v1037_v61 }
 0x629   : > { %v932_v62 = vpop.f32.mrf.mxu0  ;;  %v982_v63 = vpop.f32.mrf.mxu1 }
 0x62b   : > { %v2003_v2 = vpop.f32.mrf.mxu0  ;;  %v2009_v5 = vpop.f32.mrf.mxu1 }
 0x62d   : > { %v1029_v6 = vpop.f32.mrf.mxu0 }
 0x62e   : > { %v1036_v8 = vsel %vm2455_vm3, %v1029_v6, -inf }
 0x62f   : > { %v2014_v9 = vpop.f32.mrf.mxu0  ;;  %v1040_v11 = vsel %vm493_vm2, %v1036_v8, -inf }
 0x630   : > { %1041 = vmax.xlane.f32.xlu1 %v1040_v11 }
 0x631   : > { %v1032_v12 = vpop.f32.mrf.mxu0 }
 0x633   : > { %v2015_v13 = vpop.f32.mrf.mxu0 }
 0x641   : > { %1061 = vrot.lane.b32.xlu1 %v2437_v7, %s2288_s28 }
 0x645   : > { %1159 = vrot.lane.b32.xlu1 %v2437_v7, %s2289_s29 }
 0x649   : > { %1209 = vrot.lane.b32.xlu1 %v2440_v10, %s2289_s29  ;;  %s2294_s29 = smov 24  }
 0x64d   : > { %1207 = vrot.lane.b32.xlu1 %v2440_v10, %s2290_s15 }
 0x6b1   : > { %v1039_v14 = vpop.xlane.xlu0 %1038 }
 0x6b2   : > { %v1043_v15 = vsub.f32 %v1035_v57, %v1039_v14 }
 0x6b4   : > { %v1045_v16 = vmul.f32 1.442695, %v1043_v15 }
 0x6b6   : > { %2189 = vpow2.f32 %v1045_v16 }
 0x6b9   : > { %v1042_v17 = vpop.xlane.xlu1 %1041 }
 0x6ba   : > { %v1044_v18 = vsub.f32 %v1036_v8, %v1042_v17 }
 0x6bc   : > { %v1047_v20 = vmul.f32 1.442695, %v1044_v18 }
 0x6bd   : > { %v1062_v21 = vpop.permute.xlu1 %1061 }
 0x6be   : > { %2191 = vpow2.f32 %v1047_v20  ;;  %v1067_v22 = vsel %vm621_vm4, %v1062_v21, 0 }
 0x6bf   : > { %2017 = vmatpush3.bf16.msra.mxu1 %v1067_v22 }
 0x6c0   : > { %2028 = vmatprep.subr.bf16.mxu1 %v2279_v1 }
 0x6c1   : > { %v1160_v33 = vpop.permute.xlu1 %1159 }
 0x6c2   : > { %v1165_v35 = vsel %vm493_vm2, %v1160_v33, 0 }
 0x6c3   : > { %v2190_v23 = vpop.eup %2189 }
 0x6c4   : > { %v1049_v24 = vsel %vm493_vm2, %v2190_v23, 0.0 }
 0x6c5   : > { %1050 = vadd.xlane.f32.xlu0 %v1049_v24  ;;  %v1210_v38 = vpop.permute.xlu1 %1209 }
 0x6c6   : > { %v1215_v41 = vsel %vm493_vm2, %v1210_v38, 0 }
 0x6c9   : > { %v1208_v42 = vpop.permute.xlu1 %1207 }
 0x6cb   : > { %v2192_v25 = vpop.eup %2191 }
 0x6cc   : > { %v1052_v26 = vsel %vm493_vm2, %v2192_v25, 0.0 }
 0x6cd   : > { %1053 = vadd.xlane.f32.xlu0 %v1052_v26 }
 0x6e3   : > { %1109 = vrot.lane.b32.xlu0 %v2440_v10, %s2288_s28  ;;  %s405_s28 = sand.u32 1, %s2269_s22  }
 0x6e7   : > { %1157 = vrot.lane.b32.xlu0 %v2437_v7, %s2290_s15  ;;  %s2686_s15 = scalar_lea.hbm %s2744_s12, %s1897_s20 }
 0x74e   : > { %v1051_v27 = vpop.xlane.xlu0 %1050 }
 0x74f   : > { %2193 = vrcp.f32 %v1051_v27  ;;  %v2161_v27 = vld [vmem:[%s2734_s2 + $0x8] sm:$0xff]  }
 0x756   : > { %v1054_v28 = vpop.xlane.xlu0 %1053 }
 0x757   : > { %2195 = vrcp.f32 %v1054_v28  ;;  %v2162_v28 = vld [vmem:[%s2734_s2] sm:$0xff]  }
 0x75a   : > { %v1110_v29 = vpop.permute.xlu0 %1109 }
 0x75b   : > { %v1115_v30 = vsel %vm621_vm4, %v1110_v29, 0 }
 0x75c   : > { %v2194_v31 = vpop.eup %2193  ;;  %2023 = vmatpush3.bf16.msra.mxu0 %v1115_v30 }
 0x75d   : > { %v1057_v32 = vmul.f32 %v2194_v31, %v2190_v23  ;;  %2034 = vmatprep.subr.bf16.mxu0 %v2279_v1 }
 0x75e   : > { %v1158_v40 = vpop.permute.xlu0 %1157 }
 0x75f   : > { %v1059_v34 = vpack.c.bf16 %v1057_v32, %v1057_v32 }
 0x761   : > { %2019 = vmatmul.mubr.msk.bf16.vlgmr.msra.gmra.mxu1 %vm493_vm2, %v1059_v34 }
 0x762   : > { %2029 = vmatpush3.bf16.xpose.msra.mxu1 %v1165_v35  ;;  %2030 = vmatprep.mubr.msk.bf16.mxu1 %vm2280_vm0, %v2279_v1 }
 0x763   : > { %2040 = vmatprep.subr.bf16.mxu1 %v2279_v1 }
 0x764   : > { %v2196_v36 = vpop.eup %2195 }
 0x765   : > { %v1058_v37 = vmul.f32 %v2196_v36, %v2192_v25 }
 0x767   : > { %v1060_v39 = vpack.c.bf16 %v1058_v37, %v1058_v37 }
 0x769   : > { %2025 = vmatmul.mubr.msk.bf16.vlgmr.msra.gmra.mxu0 %vm493_vm2, %v1060_v39  ;;  %2031 = vmatmul.mubr.msk.bf16.vlgmr.msra.gmra.mxu1 %vm493_vm2, %v1158_v40 }
 0x76a   : > { %2035 = vmatpush3.bf16.xpose.msra.mxu0 %v1215_v41  ;;  %2036 = vmatprep.mubr.msk.bf16.mxu0 %vm2280_vm0, %v2279_v1 }
 0x76b   : > { %2046 = vmatprep.subr.bf16.mxu0 %v2279_v1  ;;  %2042 = vmatprep.mubr.msk.bf16.mxu1 %vm2280_vm0, %v2279_v1 }
 0x771   : > { %2037 = vmatmul.mubr.msk.bf16.vlgmr.msra.gmra.mxu0 %vm493_vm2, %v1208_v42 }
 0x772   : > { %2048 = vmatprep.mubr.msk.bf16.mxu0 %vm2280_vm0, %v2279_v1 }
 0x821   : > { %v1103_v43 = vpop.f32.mrf.mxu1 }
 0x823   : > { %v2020_v44 = vpop.f32.mrf.mxu1 }
 0x825   : > { %v1106_v45 = vpop.f32.mrf.mxu1 }
 0x827   : > { %v2021_v46 = vpop.f32.mrf.mxu1 }
 0x829   : > { %v1151_v47 = vpop.f32.mrf.mxu0  ;;  %v1201_v48 = vpop.f32.mrf.mxu1 }
 0x82a   : > { %v1257_v49 = vsel %vm2455_vm3, %v1201_v48, -inf  ;;  %v2149_v8 = vpack.i.bf16 %v1151_v47, %v1103_v43 }
 0x82b   : > { %v2026_v51 = vpop.f32.mrf.mxu0  ;;  %v2032_v52 = vpop.f32.mrf.mxu1  ;;  %v1259_v53 = vsel %vm493_vm2, %v1257_v49, -inf }
 0x82c   : > { %1260 = vmax.xlane.f32.xlu0 %v1259_v53 }
 0x82d   : > { %v1154_v55 = vpop.f32.mrf.mxu0  ;;  %v1204_v57 = vpop.f32.mrf.mxu1 }
 0x82e   : > { %v1869_v57 = vld [vmem:[%s2735_s3] ss:$0 sm:$0xff] }
 0x82f   : > { %v2027_v58 = vpop.f32.mrf.mxu0  ;;  %v2033_v59 = vpop.f32.mrf.mxu1 }
 0x831   : > { %v1251_v61 = vpop.f32.mrf.mxu0 }
 0x832   : > { %v1258_v62 = vsel %vm2455_vm3, %v1251_v61, -inf }
 0x833   : > { %v2038_v63 = vpop.f32.mrf.mxu0  ;;  %v1262_v2 = vsel %vm493_vm2, %v1258_v62, -inf }
 0x834   : > { %1263 = vmax.xlane.f32.xlu1 %v1262_v2 }
 0x835   : > { %v1254_v5 = vpop.f32.mrf.mxu0 }
 0x837   : > { %v2039_v6 = vpop.f32.mrf.mxu0 }
 0x845   : > { %1283 = vrot.lane.b32.xlu1 %v2437_v7, %s2291_s16 }
 0x849   : > { %2145 = vrot.lane.b32.xlu1 %v2144_v56, %s2745_s17 }
 0x84d   : > { %2150 = vrot.lane.b32.xlu1 %v2149_v8, %s2293_s18  ;;  %s2691_s18 = scalar_lea.sflag [#allocation3], %s405_s28 }
 0x8b5   : > { %v1261_v19 = vpop.xlane.xlu0 %1260 }
 0x8b6   : > { %v1265_v9 = vsub.f32 %v1257_v49, %v1261_v19 }
 0x8b8   : > { %v1267_v11 = vmul.f32 1.442695, %v1265_v9 }
 0x8ba   : > { %2197 = vpow2.f32 %v1267_v11 }
 0x8bd   : > { %v1264_v12 = vpop.xlane.xlu1 %1263 }
 0x8be   : > { %v1266_v13 = vsub.f32 %v1258_v62, %v1264_v12 }
 0x8c0   : > { %v1269_v14 = vmul.f32 1.442695, %v1266_v13 }
 0x8c1   : > { %v1284_v15 = vpop.permute.xlu1 %1283 }
 0x8c2   : > { %2199 = vpow2.f32 %v1269_v14  ;;  %v1289_v7 = vsel %vm621_vm4, %v1284_v15, 0 }
 0x8c3   : > { %2041 = vmatpush3.bf16.msra.mxu1 %v1289_v7 }
 0x8c4   : > { %2052 = vmatprep.subr.bf16.mxu1 %v2279_v1 }
 0x8c5   : > { %v2146_v38 = vpop.permute.xlu1 %2145 }
 0x8c6   : > { %v2148_v40 = vunpack.i.h.bf16 %v2146_v38  ;;  %v2147_v41 = vunpack.i.l.bf16 %v2146_v38  ;;  %v2172_v38 = vld [vmem:[%s2740_s8] sm:$0xff]  }
 0x8c7   : > { %v2198_v16 = vpop.eup %2197 }
 0x8c8   : > { %v1271_v50 = vsel %vm493_vm2, %v2198_v16, 0.0  ;;  %v1404_v45 = vsel %vm493_vm2, %v2495_v0, %v2148_v40  ;;  %v1403_v46 = vsel %vm493_vm2, %v2493_v60, %v2147_v41 }
 0x8c9   : > { %1272 = vadd.xlane.f32.xlu0 %v1271_v50  ;;  %v2151_v39 = vpop.permute.xlu1 %2150  ;;  %v2165_v50 = vld [vmem:[%s2740_s8 + $0x38] sm:$0xff]  }
 0x8ca   : > { %v2153_v42 = vunpack.i.h.bf16 %v2151_v39  ;;  %v2152_v43 = vunpack.i.l.bf16 %v2151_v39  ;;  %v1875_v39 = vld [vmem:[%s2739_s7] ss:$0 sm:$0xff] }
 0x8cc   : > { %v1406_v49 = vsel %vm1405_vm5, %v1403_v46, %v2152_v43  ;;  %v1407_v51 = vsel %vm1405_vm5, %v1404_v45, %v2153_v42 }
 0x8cf   : > { %v2200_v54 = vpop.eup %2199 }
 0x8d0   : > { %v1274_v56 = vsel %vm493_vm2, %v2200_v54, 0.0 }
 0x8d1   : > { %1275 = vadd.xlane.f32.xlu0 %v1274_v56 }
 0x8e7   : > { %1331 = vrot.lane.b32.xlu0 %v2440_v10, %s2291_s16  ;;  %s1845_s16 = sshll.u32 %s405_s28, 4 }
 0x8e8   : > { %s407_s26 = scalar_lea.vmem [#allocation2], %s1845_s16  ;;  %s2295_s16 = smov [#allocation2]  }
 0x8e9   : > { %s1779_s17 = sshll.u32 %s407_s26, 4  ;;  %s2221_s19 = sshll.u32 %s2295_s16, 4  ;;  %s2688_s17 = int_to_ptr.vmem [resolvable:$true] %s1779_s17  ;;  %s2222_s19 = int_to_ptr.vmem [resolvable:$false] %s2221_s19 }
 0x8ea   : > { %s2217_s25 = scalar_lea.vmem %s2688_s17, 256  ;;  %s2223_s0 = scalar_lea.vmem %s2222_s19, 512 }
 0x8eb   : > { %p2218_p11 = scmp.ne.s32.totalorder %s2688_s17, %s2217_s25  ;;  %p2224_p0 = scmp.lt.s32.totalorder %s2688_s17, %s2222_s19 }
 0x8ec   : > { %p2225_p1 = scmp.lt.s32.totalorder %s2223_s0, %s2217_s25 }
 0x8ed   : > { %p2219_p12 = pnand %p2218_p11, %p2400_p5 }
 0x8ee   : > { %p2226_p2 = por %p2225_p1, %p2224_p0 }
 0x8ef   : > { %p2220_p13 = pneg %p2219_p12 }
 0x8f1   : > { %p2227_p3 = pnand %p2226_p2, %p2220_p13 }
 0x952   : > { %v1273_v17 = vpop.xlane.xlu0 %1272 }
 0x953   : > { %2201 = vrcp.f32 %v1273_v17 }
 0x95a   : > { %v1276_v18 = vpop.xlane.xlu0 %1275 }
 0x95b   : > { %2203 = vrcp.f32 %v1276_v18 }
 0x95e   : > { %v1332_v20 = vpop.permute.xlu0 %1331 }
 0x95f   : > { %v1337_v21 = vsel %vm621_vm4, %v1332_v20, 0 }
 0x960   : > { %v2202_v22 = vpop.eup %2201  ;;  %2047 = vmatpush3.bf16.msra.mxu0 %v1337_v21 }
 0x961   : > { %v1279_v23 = vmul.f32 %v2202_v22, %v2198_v16  ;;  %2060 = vmatprep.subr.bf16.mxu0 %v2279_v1  ;;  %v2164_v16 = vld [vmem:[%s2738_s6] sm:$0xff]  }
 0x963   : > { %v1281_v24 = vpack.c.bf16 %v1279_v23, %v1279_v23 }
 0x965   : > { %2043 = vmatmul.mubr.msk.bf16.vlgmr.msra.gmra.mxu1 %vm493_vm2, %v1281_v24  ;;  %v1873_v24 = vld [vmem:[%s2736_s4] ss:$0 sm:$0xff] }
 0x966   : > { %2056 = vmatprep.mubr.msk.bf16.mxu1 %vm2280_vm0, %v2279_v1  ;;  %2053 = vmatpush3.bf16.msra.mxu1 %v2161_v27  ;;  %v1874_v27 = vld [vmem:[%s2737_s5] ss:$0 sm:$0xff] }
 0x967   : > { %2054 = vmatprep.subr.bf16.mxu1 %v2279_v1 }
 0x968   : > { %v2204_v25 = vpop.eup %2203 }
 0x969   : > { %v1280_v10 = vmul.f32 %v2204_v25, %v2200_v54 }
 0x96a   : > { %2055 = vmatpush3.bf16.msra.mxu1 %v2162_v28 }
 0x96b   : > { %v1282_v26 = vpack.c.bf16 %v1280_v10, %v1280_v10  ;;  %2068 = vmatprep.subr.bf16.mxu1 %v2279_v1 }
 0x96d   : > { %2049 = vmatmul.mubr.msk.bf16.vlgmr.msra.gmra.mxu0 %vm493_vm2, %v1282_v26 }
 0x96e   : > { %2064 = vmatprep.mubr.msk.bf16.mxu0 %vm2280_vm0, %v2279_v1 }
 0xa25   : > { %v1325_v29 = vpop.f32.mrf.mxu1 }
 0xa27   : > { %v2044_v30 = vpop.f32.mrf.mxu1 }
 0xa29   : > { %v1328_v31 = vpop.f32.mrf.mxu1 }
 0xa2b   : > { %v2045_v32 = vpop.f32.mrf.mxu1 }
 0xa2c   : > { %v2166_v32 = vld [vmem:[%s2740_s8 + $0x30] sm:$0xff]  }
 0xa2d   : > { %v1373_v33 = vpop.f32.mrf.mxu0 }
 0xa2e   : > { %v2154_v34 = vpack.i.bf16 %v1373_v33, %v1325_v29  ;;  %v2167_v33 = vld [vmem:[%s2740_s8 + $0x28] sm:$0xff]  }
 0xa2f   : > { %v2050_v35 = vpop.f32.mrf.mxu0 }
 0xa30   : > { %2155 = vrot.lane.b32.xlu0 %v2154_v34, %s2294_s29  ;;  %v2168_v34 = vld [vmem:[%s2740_s8 + $0x20] sm:$0xff]   ;;  %v2169_v35 = vld [vmem:[%s2740_s8 + $0x18] sm:$0xff]  }
 0xa31   : > { %v1376_v36 = vpop.f32.mrf.mxu0 }
 0xa32   : > { %v2170_v36 = vld [vmem:[%s2740_s8 + $0x10] sm:$0xff]  }
 0xa33   : > { %v2051_v37 = vpop.f32.mrf.mxu0 }
 0xa34   : > { %v2171_v37 = vld [vmem:[%s2740_s8 + $0x8] sm:$0xff]  }
 0xaa2   : > { %v2156_v44 = vpop.permute.xlu0 %2155 }
 0xaa3   : > { %v2158_v47 = vunpack.i.h.bf16 %v2156_v44  ;;  %v2157_v48 = vunpack.i.l.bf16 %v2156_v44 }
 0xaa5   : > { %v1410_v52 = vsel %vm1408_vm6, %v1407_v51, %v2158_v47  ;;  %v1409_v53 = vsel %vm1408_vm6, %v1406_v49, %v2157_v48 }
 0xaa6   : > { %v1411_v55 = vpack.c.bf16 %v1410_v52, %v1409_v53 }
 0xaa8   : > { %2057 = vmatmul.mubr.msk.bf16.vlgmr.msra.gmra.mxu1 %vm435_vm1, %v1411_v55 }
 0xaa9   : > { %2084 = vmatprep.mubr.msk.bf16.mxu1 %vm2280_vm0, %v2279_v1  ;;  %2069 = vmatpush3.bf16.msra.mxu1 %v2165_v50 }
 0xaaa   : > { %2070 = vmatprep.subr.bf16.mxu1 %v2279_v1 }
 0xaad   : > { %2071 = vmatpush3.bf16.msra.mxu1 %v2166_v32 }
 0xaae   : > { %2072 = vmatprep.subr.bf16.mxu1 %v2279_v1 }
 0xab1   : > { %2073 = vmatpush3.bf16.msra.mxu1 %v2167_v33 }
 0xab2   : > { %2074 = vmatprep.subr.bf16.mxu1 %v2279_v1 }
 0xab5   : > { %2075 = vmatpush3.bf16.msra.mxu1 %v2168_v34 }
 0xab6   : > { %2076 = vmatprep.subr.bf16.mxu1 %v2279_v1 }
 0xab9   : > { %2077 = vmatpush3.bf16.msra.mxu1 %v2169_v35 }
 0xaba   : > { %2078 = vmatprep.subr.bf16.mxu1 %v2279_v1 }
 0xabd   : > { %2079 = vmatpush3.bf16.msra.mxu1 %v2170_v36 }
 0xabe   : > { %2080 = vmatprep.subr.bf16.mxu1 %v2279_v1 }
 0xac1   : > { %2081 = vmatpush3.bf16.msra.mxu1 %v2171_v37 }
 0xac2   : > { %2082 = vmatprep.subr.bf16.mxu1 %v2279_v1 }
 0xac5   : > { %2083 = vmatpush3.bf16.msra.mxu1 %v2172_v38 }
 0xb68   : > { %v1472_v0 = vpop.f32.mrf.mxu1 }
 0xb69   : > { %v1473_v58 = vadd.f32 %v1869_v57, %v1472_v0 }
 0xb6a   : > { %v2058_v59 = vpop.f32.mrf.mxu1 }
 0xb6b   : > { %v1479_v60 = vadd.f32 %v1473_v58, %v2428_v3  ;;  %v1879_v58 = vld [vmem:[%s2741_s9] ss:$0 sm:$0xff] }
 0xb6c   : > { %v1475_v61 = vpop.f32.mrf.mxu1 }
 0xb6d   : > { %v1476_v62 = vadd.f32 %v1869_v57, %v1475_v61  ;;  %v1483_v63 = vsel %vm435_vm1, %v1479_v60, 0.0 }
 0xb6e   : > { %1484 = vadd.xlane.f32.xlu1 %v1483_v63  ;;  %v2059_v2 = vpop.f32.mrf.mxu1 }
 0xb6f   : > { %v1480_v5 = vadd.f32 %v1476_v62, %v2430_v4  ;;  %v2163_v4 = vld [vmem:[%s2738_s6 + $0x8] sm:$0xff]  }
 0xb70   : > { %2061 = vmatpush3.bf16.msra.mxu0 %v2163_v4 }
 0xb71   : > { %v1486_v6 = vsel %vm435_vm1, %v1480_v5, 0.0  ;;  %2062 = vmatprep.subr.bf16.mxu0 %v2279_v1 }
 0xb72   : > { %1487 = vadd.xlane.f32.xlu0 %v1486_v6 }
 0xb74   : > { %2063 = vmatpush3.bf16.msra.mxu0 %v2164_v16 }
 0xbf7   : > { %v1485_v8 = vpop.xlane.xlu1 %1484 }
 0xbf8   : > { %v1490_v19 = vmul.f32 0.03125, %v1485_v8 }
 0xbfa   : > { %v1492_v9 = vsub.f32 %v1479_v60, %v1490_v19 }
 0xbfb   : > { %v1488_v11 = vpop.xlane.xlu0 %1487 }
 0xbfc   : > { %v1491_v12 = vmul.f32 0.03125, %v1488_v11  ;;  %v1494_v13 = vmul.f32 %v1492_v9, %v1492_v9 }
 0xbfe   : > { %v1493_v14 = vsub.f32 %v1480_v5, %v1491_v12  ;;  %v1496_v3 = vsel %vm435_vm1, %v1494_v13, 0.0 }
 0xbff   : > { %1497 = vadd.xlane.f32.xlu0 %v1496_v3 }
 0xc00   : > { %v1495_v15 = vmul.f32 %v1493_v14, %v1493_v14 }
 0xc02   : > { %v1499_v7 = vsel %vm435_vm1, %v1495_v15, 0.0 }
 0xc03   : > { %1500 = vadd.xlane.f32.xlu1 %v1499_v7 }
 0xc88   : > { %v1498_v54 = vpop.xlane.xlu0 %1497 }
 0xc89   : > { %v1502_v56 = vmul.f32 0.03125, %v1498_v54 }
 0xc8b   : > { %v1504_v17 = vadd.f32 1e-05, %v1502_v56 }
 0xc8c   : > { %v1501_v18 = vpop.xlane.xlu1 %1500 }
 0xc8d   : > { %2205 = vrsqrt.f32 %v1504_v17  ;;  %v1503_v20 = vmul.f32 0.03125, %v1501_v18 }
 0xc8f   : > { %v1505_v21 = vadd.f32 1e-05, %v1503_v20 }
 0xc91   : > { %2207 = vrsqrt.f32 %v1505_v21 }
 0xc9a   : > { %v2206_v22 = vpop.eup %2205 }
 0xc9b   : > { %v1508_v23 = vmul.f32 %v2206_v22, %v1492_v9  ;;  %v1888_v22 = vld [vmem:[%s2742_s10] ss:$0 sm:$0xff] }
 0xc9d   : > { %v1516_v26 = vmul.f32 %v1873_v24, %v1508_v23 }
 0xc9e   : > { %v2208_v25 = vpop.eup %2207 }
 0xc9f   : > { %v1509_v10 = vmul.f32 %v2208_v25, %v1493_v14  ;;  %v1524_v29 = vadd.f32 %v1874_v27, %v1516_v26 }
 0xca1   : > { %v1517_v28 = vmul.f32 %v1873_v24, %v1509_v10  ;;  %v1889_v24 = vld [vmem:[%s2743_s11] ss:$0 sm:$0xff] }
 0xca3   : > { %v1525_v30 = vadd.f32 %v1874_v27, %v1517_v28 }
 0xca5   : > { %v1526_v31 = vpack.c.bf16 %v1525_v30, %v1524_v29 }
 0xca7   : > { %2065 = vmatmul.mubr.msk.bf16.vlgmr.msra.gmra.mxu0 %vm435_vm1, %v1526_v31 }
 0xd67   : > { %v1587_v40 = vpop.f32.mrf.mxu0 }
 0xd68   : > { %v1588_v41 = vadd.f32 %v1875_v39, %v1587_v40 }
 0xd69   : > { %v2066_v42 = vpop.f32.mrf.mxu0 }
 0xd6a   : > { %v1596_v43 = vmul.f32 0.70710677, %v1588_v41  ;;  %v1594_v51 = vmul.f32 0.5, %v1588_v41 }
 0xd6b   : > { %v1590_v44 = vpop.f32.mrf.mxu0 }
 0xd6c   : > { %2209 = verf.f32 %v1596_v43  ;;  %v1591_v45 = vadd.f32 %v1875_v39, %v1590_v44 }
 0xd6d   : > { %v2067_v46 = vpop.f32.mrf.mxu0 }
 0xd6e   : > { %v1597_v47 = vmul.f32 0.70710677, %v1591_v45  ;;  %v1595_v52 = vmul.f32 0.5, %v1591_v45 }
 0xd70   : > { %2211 = verf.f32 %v1597_v47 }
 0xd79   : > { %v2210_v1 = vpop.eup %2209 }
 0xd7a   : > { %v1600_v48 = vadd.f32 1.0, %v2210_v1 }
 0xd7c   : > { %v1602_v55 = vmul.f32 %v1600_v48, %v1594_v51 }
 0xd7d   : > { %v2212_v49 = vpop.eup %2211 }
 0xd7e   : > { %v1601_v53 = vadd.f32 1.0, %v2212_v49 }
 0xd80   : > { %v1603_v57 = vmul.f32 %v1601_v53, %v1595_v52 }
 0xd82   : > { %v1604_v0 = vpack.c.bf16 %v1603_v57, %v1602_v55 }
 0xd84   : > { %2085 = vmatmul.mubr.bf16.vlgmr.msra.gmra.mxu1 %v1604_v0 }
 0xe44   : > { %v1710_v59 = vpop.f32.mrf.mxu1 }
 0xe45   : > { %v1711_v60 = vadd.f32 %v1879_v58, %v1710_v59 }
 0xe46   : > { %v2086_v61 = vpop.f32.mrf.mxu1 }
 0xe47   : > { %v1717_v62 = vadd.f32 %v1711_v60, %v1524_v29 }
 0xe48   : > { %v1713_v63 = vpop.f32.mrf.mxu1 }
 0xe49   : > { %v1714_v2 = vadd.f32 %v1879_v58, %v1713_v63  ;;  %v1721_v5 = vsel %vm435_vm1, %v1717_v62, 0.0 }
 0xe4a   : > { %1722 = vadd.xlane.f32.xlu0 %v1721_v5  ;;  %v2087_v6 = vpop.f32.mrf.mxu1 }
 0xe4b   : > { %v1718_v8 = vadd.f32 %v1714_v2, %v1525_v30 }
 0xe4d   : > { %v1724_v19 = vsel %vm435_vm1, %v1718_v8, 0.0 }
 0xe4e   : > { %1725 = vadd.xlane.f32.xlu1 %v1724_v19 }
 0xed3   : > { %v1723_v9 = vpop.xlane.xlu0 %1722 }
 0xed4   : > { %v1727_v11 = vmul.f32 0.03125, %v1723_v9 }
 0xed6   : > { %v1729_v12 = vsub.f32 %v1717_v62, %v1727_v11 }
 0xed7   : > { %v1726_v13 = vpop.xlane.xlu1 %1725 }
 0xed8   : > { %v1728_v14 = vmul.f32 0.03125, %v1726_v13  ;;  %v1731_v3 = vmul.f32 %v1729_v12, %v1729_v12 }
 0xeda   : > { %v1730_v15 = vsub.f32 %v1718_v8, %v1728_v14  ;;  %v1733_v7 = vsel %vm435_vm1, %v1731_v3, 0.0 }
 0xedb   : > { %1734 = vadd.xlane.f32.xlu0 %v1733_v7 }
 0xedc   : > { %v1732_v4 = vmul.f32 %v1730_v15, %v1730_v15 }
 0xede   : > { %v1736_v16 = vsel %vm435_vm1, %v1732_v4, 0.0 }
 0xedf   : > { %1737 = vadd.xlane.f32.xlu1 %v1736_v16 }
 0xf64   : > { %v1735_v50 = vpop.xlane.xlu0 %1734 }
 0xf65   : > { %v1739_v54 = vmul.f32 0.03125, %v1735_v50 }
 0xf67   : > { %v1741_v56 = vadd.f32 1e-05, %v1739_v54 }
 0xf68   : > { %v1738_v17 = vpop.xlane.xlu1 %1737 }
 0xf69   : > { %2213 = vrsqrt.f32 %v1741_v56  ;;  %v1740_v18 = vmul.f32 0.03125, %v1738_v17 }
 0xf6b   : > { %v1742_v20 = vadd.f32 1e-05, %v1740_v18 }
 0xf6d   : > { %2215 = vrsqrt.f32 %v1742_v20 }
 0xf76   : > { %v2214_v21 = vpop.eup %2213 }
 0xf77   : > { %v1745_v23 = vmul.f32 %v2214_v21, %v1729_v12 }
 0xf79   : > { %v1753_v25 = vmul.f32 %v1888_v22, %v1745_v23 }
 0xf7a   : > { %v2216_v10 = vpop.eup %2215 }
 0xf7b   : > { %v1746_v26 = vmul.f32 %v2216_v10, %v1730_v15  ;;  %v1761_v27 = vadd.f32 %v1889_v24, %v1753_v25 }
 0xf7d   : > { %v1754_v28 = vmul.f32 %v1888_v22, %v1746_v26  ;;  %1763 = vst.msk [vmem:[%s407_s26] sm:$0xff] %vm435_vm1, %v1761_v27 }
 0xf7f   : > { %v1762_v29 = vadd.f32 %v1889_v24, %v1754_v28 }
 0xf81   : > { %1764 = vst.msk [vmem:[%s407_s26 + $0x8] sm:$0xff] %vm435_vm1, %v1762_v29 }
 0xf82   : > { %2230 = shalt.err (!%p2227_p3)
}
 0xf83   : > { %s2231_s28 = scalar_lea.hbm %s2686_s15, 256  ;;  %s2235_s29 = scalar_lea.hbm %s2744_s12, 512 }
 0xf84   : > { %p2232_p4 = scmp.ne.s32.totalorder %s2686_s15, %s2231_s28  ;;  %p2236_p9 = scmp.lt.s32.totalorder %s2686_s15, %s2744_s12 }
 0xf85   : > { %p2237_p10 = scmp.lt.s32.totalorder %s2235_s29, %s2231_s28 }
 0xf86   : > { %p2233_p7 = pnand %p2232_p4, %p2400_p5 }
 0xf87   : > { %p2238_p11 = por %p2237_p10, %p2236_p9 }
 0xf88   : > { %p2234_p8 = pneg %p2233_p7 }
 0xf8a   : > { %p2239_p12 = pnand %p2238_p11, %p2234_p8 }
 0xf8c   : > { %2242 = shalt.err (!%p2239_p12)
}
 0xf8d   : > { %s2296_s25 = smov 128   ;;  %s2754_s19 = smov 8  }
 0xf8e   : > { %2088 = dma.vmem_to_hbm [thread:$0]  (%p2400_p5), %s2688_s17, 256, %s2686_s15, %s2691_s18, %s2296_s25, %s2296_s25, %s2754_s19  }
 0xf8f PF: > { %p2094_p13 = scmp.ge.s32.totalorder %s2277_s24, 2  ;;  %s1794_s0 = sand.u32 1, %s2265_s21  }
 0xf90   : > { %s1795_s1 = scalar_lea.sflag [#allocation3], %s1794_s0 }
 0xf91   : > { %p2091_p0 = pnand %p2094_p13, %p2404_p6 }
 0xf93   : > { %p2092_p1 = pneg %p2091_p0 }
 0xf95   : > { %2260 = dma.done.wait (%p2092_p1), %s1795_s1, 256  }
 0xf96   : > { %2262 = vsyncadd (%p2092_p1), %s1795_s1, 4294967040  ;;  %p22_p2 = scmp.ge.s32.totalorder %s2387_s27, 4   ;;  %s2755_s21 = smov %s2269_s22 }
 0xf97   : > { %s2756_s22 = smov %s2273_s23  ;;  %s2757_s23 = smov %s2398_s30 }
 0xf98   : > { %s2758_s24 = smov %s2387_s27  ;;  %24 = sbr.rel (!%p22_p2) target bundleno = 6 (0x6), region = 103 }
 0xf9d   :  { %1800 = vsyncpa [#allocation3], 1 }
 0xf9e   :  { %1802 = vsyncpa [#allocation3 + $0x1], 1 }

// kernel: tpu_custom_call.1
= control target key start
LH: loop header
LB: loop body
LE: loop exit
PB: predicated region body
PF: predicated region fallthrough
CT: control target
= control target key end

     0   :  { %s2732_s0 = inlined_call_operand.vmem [shape: f32[4,8,32], index: 0, kind: input, shape index: {}]   ;;  %s2733_s1 = inlined_call_operand.vmem [shape: bf16[32,96], index: 1, kind: input, shape index: {}]   ;;  %s2734_s2 = inlined_call_operand.vmem [shape: bf16[32,32], index: 2, kind: input, shape index: {}]   ;;  %s2735_s3 = inlined_call_operand.vmem [shape: f32[1,32], index: 3, kind: input, shape index: {}]   ;;  %s2736_s4 = inlined_call_operand.vmem [shape: f32[1,32], index: 4, kind: input, shape index: {}]   ;;  %s2737_s5 = inlined_call_operand.vmem [shape: f32[1,32], index: 5, kind: input, shape index: {}]   ;;  %s2738_s6 = inlined_call_operand.vmem [shape: bf16[32,128], index: 6, kind: input, shape index: {}]   ;;  %s2739_s7 = inlined_call_operand.vmem [shape: f32[1,128], index: 7, kind: input, shape index: {}]   ;;  %s2740_s8 = inlined_call_operand.vmem [shape: bf16[128,32], index: 8, kind: input, shape index: {}]   ;;  %s2741_s9 = inlined_call_operand.vmem [shape: f32[1,32], index: 9, kind: input, shape index: {}]   ;;  %s2742_s10 = inlined_call_operand.vmem [shape: f32[1,32], index: 10, kind: input, shape index: {}]   ;;  %s2743_s11 = inlined_call_operand.vmem [shape: f32[1,32], index: 11, kind: input, shape index: {}]   ;;  %s2744_s12 = inlined_call_operand.hbm [shape: f32[4,8,32], index: 12, kind: output, shape index: {}]  }
   0x1   :  { %2746 = sst [smem:[#allocation5_spill]] %s2732_s0 }
   0x2   :  { %2747 = sst [smem:[#allocation6_spill]] %s2733_s1 }
   0x3   :  { %17 = vsyncpa [#allocation3], 0 }
   0x4   :  { %19 = vsyncpa [#allocation3 + $0x1], 0  ;;  %s2362_s21 = smov 0   ;;  %s2364_s22 = smov 0  }
   0x5   :  { %s2366_s23 = smov 0   ;;  %s2368_s24 = smov 0  }
   0x6 LB: > { %s2383_s25 = sadd.s32 4294967295, %s2277_s24   ;;  %s1841_s26 = sadd.s32 4294967294, %s2277_s24   ;;  %s2277_s24 = sphi %s2368_s24, %s2758_s24   ;;  %s2273_s23 = sphi %s2366_s23, %s2757_s23   ;;  %s2269_s22 = sphi %s2364_s22, %s2756_s22   ;;  %s2265_s21 = sphi %s2362_s21, %s2755_s21  }
   0x7   : > { %s2387_s27 = sadd.s32 1, %s2277_s24   ;;  %s289_s28 = sadd.s32 1, %s2273_s23 }
   0x8   : > { %s286_s29 = ssub.s32 %s2277_s24, %s2387_s27  ;;  %p299_p0 = scmp.ne.s32.totalorder %s2273_s23, %s2269_s22 }
   0x9   : > { %p287_p1 = scmp.eq.s32.totalorder %s286_s29, 0  ;;  %p300_p2 = scmp.eq.s32.totalorder %s2383_s25, 1 }
   0xa   : > { %p305_p3 = scmp.ne.s32.totalorder %s2269_s22, %s2265_s21  ;;  %p306_p4 = scmp.eq.s32.totalorder %s1841_s26, 1 }
   0xb   : > { %s2398_s30 = scalar_select %p287_p1, %s2273_s23, %s289_s28  }
   0xc   : > { %p2400_p5 = por %p300_p2, %p299_p0  ;;  %p2404_p6 = por %p306_p4, %p305_p3 }
   0xd   : > { %p1844_p7 = scmp.ge.s32.totalorder %s2277_s24, 1  ;;  %p366_p8 = scmp.lt.s32.totalorder %s2277_s24, 3 }
   0xf   : > { %p367_p9 = pnand %p1844_p7, %p366_p8 }
  0x10   : > { %s2750_s1 = sld [smem:[#allocation6_spill]] (!%p367_p9)  ;;  %s1846_s19 = sshll.u32 (!%p367_p9), %s2383_s25, 1 }
  0x11   : > { %370 = sbr.rel (%p367_p9) target bundleno = 3983 (0xf8f), region = 68  ;;  %p409_p10 = scmp.lt.s32.totalorder (!%p367_p9), %s1846_s19, 3 }
  0x12   : > { %s2751_s0 = sld [smem:[#allocation5_spill]] (!%p367_p9)  ;;  %s2281_s15 = smov (!%p367_p9), 96  }
  0x13   : > { %s2282_s16 = smov (!%p367_p9), 64   ;;  %s2283_s17 = smov (!%p367_p9), 88  }
  0x14   : > { %s2284_s18 = smov (!%p367_p9), 120   ;;  %s2287_s26 = smov (!%p367_p9), 112  }
  0x15   : > { %s2288_s28 = smov (!%p367_p9), 48  }
  0x16   : > { %v2159_v0 = vld [vmem:[%s2750_s1 + $0x8] sm:$0xff]   ;;  %v2279_v1 = vmov 0.0   ;;  %v2160_v2 = vld [vmem:[%s2750_s1] sm:$0xff]   ;;  %vm2280_vm0 = vmmov 0   ;;  %s2760_s19 = smov (!%p409_p10, %s1846_s19), 3  ;;  %vm435_vm1 = vcmask 261120   ;;  %v486_v16 = vlaneseq }
  0x17   : > { %1948 = vmatprep.subr.bf16.mxu0 %v2279_v1  ;;  %1968 = vmatprep.subr.bf16.mxu1 %v2279_v1  ;;  %s1847_s20 = sshll.u32 %s2760_s19, 3  ;;  %vm493_vm2 = vcmask 64512   ;;  %vm621_vm4 = vcmask 1043456   ;;  %s2285_s19 = smov 56   ;;  %vm1405_vm5 = vcmask 130048   ;;  %vm1408_vm6 = vcmask 195584  }
  0x18   : > { %1949 = vmatpush3.bf16.msra.mxu0 %v2159_v0  ;;  %1952 = vmatprep.mubr.msk.bf16.mxu0 %vm2280_vm0, %v2279_v1  ;;  %s412_s29 = scalar_lea.vmem %s2751_s0, %s1847_s20  ;;  %v487_v17 = vshrl.u32 %v486_v16, 7  ;;  %v489_v18 = vand.u32 127, %v486_v16  ;;  %s2286_s20 = smov 80  }
  0x19   : > { %1950 = vmatprep.subr.bf16.mxu0 %v2279_v1  ;;  %1970 = vmatprep.mubr.msk.bf16.mxu1 %vm2280_vm0, %v2279_v1  ;;  %v2428_v3 = vld [vmem:[%s412_s29] sm:$0xff]  ;;  %v2430_v4 = vld [vmem:[%s412_s29 + $0x8] sm:$0xff]  ;;  %s2289_s29 = smov 72  }
  0x1a   : > { %v418_v5 = vpack.c.bf16 %v2430_v4, %v2428_v3  ;;  %vm2455_vm3 = vcmp.le.s32.totalorder %v489_v18, %v487_v17 }
  0x1c   : > { %1951 = vmatpush3.bf16.msra.mxu0 %v2160_v2 }
  0x1d   : > { %1956 = vmatprep.subr.bf16.mxu0 %v2279_v1 }
  0x1f   : > { %1953 = vmatmul.mubr.msk.bf16.vlgmr.msra.gmra.mxu0 %vm435_vm1, %v418_v5 }
  0x20   : > { %1958 = vmatprep.mubr.msk.bf16.mxu0 %vm2280_vm0, %v2279_v1 }
  0xdf   : > { %v473_v6 = vpop.f32.mrf.mxu0 }
  0xe0   : > { %v2437_v7 = vpack.c.bf16 %v473_v6, %v473_v6 }
  0xe1   : > { %v1954_v8 = vpop.f32.mrf.mxu0 }
  0xe2   : > { %491 = vrot.lane.b32.xlu0 %v2437_v7, %s2281_s15 }
  0xe3   : > { %v476_v9 = vpop.f32.mrf.mxu0 }
  0xe4   : > { %v2440_v10 = vpack.c.bf16 %v476_v9, %v476_v9 }
  0xe5   : > { %v1955_v11 = vpop.f32.mrf.mxu0 }
  0xe6   : > { %540 = vrot.lane.b32.xlu0 %v2440_v10, %s2281_s15  ;;  %s2290_s15 = smov 104  }
 0x154   : > { %v492_v12 = vpop.permute.xlu0 %491 }
 0x155   : > { %v498_v13 = vsel %vm493_vm2, %v492_v12, 0 }
 0x156   : > { %1957 = vmatpush3.bf16.xpose.msra.mxu0 %v498_v13 }
 0x157   : > { %1962 = vmatprep.subr.bf16.mxu0 %v2279_v1 }
 0x158   : > { %v541_v14 = vpop.permute.xlu0 %540 }
 0x159   : > { %v546_v15 = vsel %vm493_vm2, %v541_v14, 0 }
 0x15d   : > { %1959 = vmatmul.mubr.msk.bf16.vlgmr.msra.gmra.mxu0 %vm493_vm2, %v2437_v7 }
 0x15e   : > { %1963 = vmatpush3.bf16.xpose.msra.mxu0 %v546_v15  ;;  %1964 = vmatprep.mubr.msk.bf16.mxu0 %vm2280_vm0, %v2279_v1 }
 0x15f   : > { %1974 = vmatprep.subr.bf16.mxu0 %v2279_v1 }
 0x165   : > { %1965 = vmatmul.mubr.msk.bf16.vlgmr.msra.gmra.mxu0 %vm493_vm2, %v2440_v10 }
 0x166   : > { %1976 = vmatprep.mubr.msk.bf16.mxu0 %vm2280_vm0, %v2279_v1 }
 0x21d   : > { %v534_v20 = vpop.f32.mrf.mxu0 }
 0x21e   : > { %v590_v21 = vsel %vm2455_vm3, %v534_v20, -inf }
 0x21f   : > { %v1960_v22 = vpop.f32.mrf.mxu0  ;;  %v592_v23 = vsel %vm493_vm2, %v590_v21, -inf }
 0x220   : > { %593 = vmax.xlane.f32.xlu1 %v592_v23 }
 0x221   : > { %v537_v24 = vpop.f32.mrf.mxu0 }
 0x223   : > { %v1961_v25 = vpop.f32.mrf.mxu0 }
 0x225   : > { %v582_v26 = vpop.f32.mrf.mxu0 }
 0x226   : > { %v591_v27 = vsel %vm2455_vm3, %v582_v26, -inf }
 0x227   : > { %v1966_v28 = vpop.f32.mrf.mxu0  ;;  %v595_v29 = vsel %vm493_vm2, %v591_v27, -inf }
 0x228   : > { %596 = vmax.xlane.f32.xlu1 %v595_v29 }
 0x229   : > { %v585_v30 = vpop.f32.mrf.mxu0 }
 0x22b   : > { %v1967_v31 = vpop.f32.mrf.mxu0 }
 0x239   : > { %616 = vrot.lane.b32.xlu1 %v2437_v7, %s2282_s16 }
 0x23d   : > { %665 = vrot.lane.b32.xlu1 %v2440_v10, %s2282_s16  ;;  %s2291_s16 = smov 40  }
 0x241   : > { %715 = vrot.lane.b32.xlu1 %v2437_v7, %s2283_s17 }
 0x2a9   : > { %v594_v32 = vpop.xlane.xlu1 %593 }
 0x2aa   : > { %v598_v33 = vsub.f32 %v590_v21, %v594_v32 }
 0x2ac   : > { %v600_v34 = vmul.f32 1.442695, %v598_v33 }
 0x2ae   : > { %2173 = vpow2.f32 %v600_v34 }
 0x2b1   : > { %v597_v35 = vpop.xlane.xlu1 %596 }
 0x2b2   : > { %v599_v36 = vsub.f32 %v591_v27, %v597_v35 }
 0x2b4   : > { %v602_v37 = vmul.f32 1.442695, %v599_v36 }
 0x2b5   : > { %v617_v38 = vpop.permute.xlu1 %616 }
 0x2b6   : > { %2175 = vpow2.f32 %v602_v37  ;;  %v623_v39 = vsel %vm621_vm4, %v617_v38, 0 }
 0x2b7   : > { %1969 = vmatpush3.bf16.msra.mxu1 %v623_v39 }
 0x2b8   : > { %1980 = vmatprep.subr.bf16.mxu1 %v2279_v1 }
 0x2b9   : > { %v666_v40 = vpop.permute.xlu1 %665 }
 0x2ba   : > { %v671_v41 = vsel %vm621_vm4, %v666_v40, 0 }
 0x2bb   : > { %v2174_v42 = vpop.eup %2173  ;;  %1975 = vmatpush3.bf16.msra.mxu0 %v671_v41 }
 0x2bc   : > { %v604_v43 = vsel %vm493_vm2, %v2174_v42, 0.0  ;;  %1986 = vmatprep.subr.bf16.mxu0 %v2279_v1 }
 0x2bd   : > { %605 = vadd.xlane.f32.xlu0 %v604_v43  ;;  %v716_v47 = vpop.permute.xlu1 %715 }
 0x2be   : > { %v721_v52 = vsel %vm493_vm2, %v716_v47, 0 }
 0x2c3   : > { %v2176_v44 = vpop.eup %2175 }
 0x2c4   : > { %v607_v45 = vsel %vm493_vm2, %v2176_v44, 0.0 }
 0x2c5   : > { %608 = vadd.xlane.f32.xlu1 %v607_v45 }
 0x2d3   : > { %713 = vrot.lane.b32.xlu0 %v2437_v7, %s2284_s18 }
 0x2d6   : > { %765 = vrot.lane.b32.xlu1 %v2440_v10, %s2283_s17  ;;  %s2745_s17 = smov 8  }
 0x2da   : > { %763 = vrot.lane.b32.xlu1 %v2440_v10, %s2284_s18  ;;  %s2293_s18 = smov 16  }
 0x346   : > { %v606_v46 = vpop.xlane.xlu0 %605 }
 0x347   : > { %2177 = vrcp.f32 %v606_v46 }
 0x34a   : > { %v714_v57 = vpop.permute.xlu0 %713 }
 0x34e   : > { %v609_v48 = vpop.xlane.xlu1 %608 }
 0x34f   : > { %2179 = vrcp.f32 %v609_v48 }
 0x352   : > { %v766_v55 = vpop.permute.xlu1 %765 }
 0x353   : > { %v771_v58 = vsel %vm493_vm2, %v766_v55, 0 }
 0x354   : > { %v2178_v49 = vpop.eup %2177 }
 0x355   : > { %v612_v50 = vmul.f32 %v2178_v49, %v2174_v42 }
 0x356   : > { %v764_v59 = vpop.permute.xlu1 %763 }
 0x357   : > { %v614_v51 = vpack.c.bf16 %v612_v50, %v612_v50 }
 0x359   : > { %1971 = vmatmul.mubr.msk.bf16.vlgmr.msra.gmra.mxu1 %vm493_vm2, %v614_v51 }
 0x35a   : > { %1981 = vmatpush3.bf16.xpose.msra.mxu1 %v721_v52  ;;  %1982 = vmatprep.mubr.msk.bf16.mxu1 %vm2280_vm0, %v2279_v1 }
 0x35b   : > { %1992 = vmatprep.subr.bf16.mxu1 %v2279_v1 }
 0x35c   : > { %v2180_v53 = vpop.eup %2179 }
 0x35d   : > { %v613_v54 = vmul.f32 %v2180_v53, %v2176_v44 }
 0x35f   : > { %v615_v56 = vpack.c.bf16 %v613_v54, %v613_v54 }
 0x361   : > { %1977 = vmatmul.mubr.msk.bf16.vlgmr.msra.gmra.mxu0 %vm493_vm2, %v615_v56  ;;  %1983 = vmatmul.mubr.msk.bf16.vlgmr.msra.gmra.mxu1 %vm493_vm2, %v714_v57 }
 0x362   : > { %1987 = vmatpush3.bf16.xpose.msra.mxu0 %v771_v58  ;;  %1988 = vmatprep.mubr.msk.bf16.mxu0 %vm2280_vm0, %v2279_v1 }
 0x363   : > { %1998 = vmatprep.subr.bf16.mxu0 %v2279_v1  ;;  %1994 = vmatprep.mubr.msk.bf16.mxu1 %vm2280_vm0, %v2279_v1 }
 0x369   : > { %1989 = vmatmul.mubr.msk.bf16.vlgmr.msra.gmra.mxu0 %vm493_vm2, %v764_v59 }
 0x36a   : > { %2000 = vmatprep.mubr.msk.bf16.mxu0 %vm2280_vm0, %v2279_v1 }
 0x419   : > { %v2493_v60 = vpop.f32.mrf.mxu1 }
 0x41b   : > { %v1972_v61 = vpop.f32.mrf.mxu1 }
 0x41d   : > { %v662_v62 = vpop.f32.mrf.mxu1 }
 0x41f   : > { %v1973_v63 = vpop.f32.mrf.mxu1 }
 0x421   : > { %v2495_v0 = vpop.f32.mrf.mxu0  ;;  %v757_v2 = vpop.f32.mrf.mxu1 }
 0x422   : > { %v813_v5 = vsel %vm2455_vm3, %v757_v2, -inf }
 0x423   : > { %v1978_v6 = vpop.f32.mrf.mxu0  ;;  %v1984_v8 = vpop.f32.mrf.mxu1  ;;  %v815_v9 = vsel %vm493_vm2, %v813_v5, -inf }
 0x424   : > { %816 = vmax.xlane.f32.xlu1 %v815_v9 }
 0x425   : > { %v710_v11 = vpop.f32.mrf.mxu0  ;;  %v760_v12 = vpop.f32.mrf.mxu1 }
 0x427   : > { %v1979_v13 = vpop.f32.mrf.mxu0  ;;  %v1985_v14 = vpop.f32.mrf.mxu1 }
 0x429   : > { %v807_v15 = vpop.f32.mrf.mxu0 }
 0x42a   : > { %v814_v16 = vsel %vm2455_vm3, %v807_v15, -inf }
 0x42b   : > { %v1990_v17 = vpop.f32.mrf.mxu0  ;;  %v818_v18 = vsel %vm493_vm2, %v814_v16, -inf }
 0x42c   : > { %819 = vmax.xlane.f32.xlu0 %v818_v18 }
 0x42d   : > { %v810_v20 = vpop.f32.mrf.mxu0 }
 0x42f   : > { %v1991_v21 = vpop.f32.mrf.mxu0 }
 0x435   : > { %839 = vrot.lane.b32.xlu1 %v2437_v7, %s2285_s19 }
 0x439   : > { %937 = vrot.lane.b32.xlu1 %v2437_v7, %s2286_s20 }
 0x442   : > { %887 = vrot.lane.b32.xlu0 %v2440_v10, %s2285_s19 }
 0x446   : > { %935 = vrot.lane.b32.xlu0 %v2437_v7, %s2287_s26 }
 0x4ad   : > { %v817_v22 = vpop.xlane.xlu1 %816 }
 0x4ae   : > { %v821_v23 = vsub.f32 %v813_v5, %v817_v22 }
 0x4b0   : > { %v823_v24 = vmul.f32 1.442695, %v821_v23 }
 0x4b1   : > { %v840_v25 = vpop.permute.xlu1 %839 }
 0x4b2   : > { %2181 = vpow2.f32 %v823_v24  ;;  %v845_v26 = vsel %vm621_vm4, %v840_v25, 0 }
 0x4b3   : > { %1993 = vmatpush3.bf16.msra.mxu1 %v845_v26 }
 0x4b4   : > { %2004 = vmatprep.subr.bf16.mxu1 %v2279_v1 }
 0x4b5   : > { %v820_v27 = vpop.xlane.xlu0 %819  ;;  %v938_v36 = vpop.permute.xlu1 %937 }
 0x4b6   : > { %v822_v28 = vsub.f32 %v814_v16, %v820_v27  ;;  %v943_v42 = vsel %vm493_vm2, %v938_v36, 0 }
 0x4b8   : > { %v825_v29 = vmul.f32 1.442695, %v822_v28 }
 0x4b9   : > { %v888_v30 = vpop.permute.xlu0 %887 }
 0x4ba   : > { %2183 = vpow2.f32 %v825_v29  ;;  %v893_v31 = vsel %vm621_vm4, %v888_v30, 0 }
 0x4bb   : > { %1999 = vmatpush3.bf16.msra.mxu0 %v893_v31 }
 0x4bc   : > { %2010 = vmatprep.subr.bf16.mxu0 %v2279_v1 }
 0x4bd   : > { %v936_v47 = vpop.permute.xlu0 %935 }
 0x4bf   : > { %v2182_v32 = vpop.eup %2181 }
 0x4c0   : > { %v827_v33 = vsel %vm493_vm2, %v2182_v32, 0.0 }
 0x4c1   : > { %828 = vadd.xlane.f32.xlu1 %v827_v33 }
 0x4c7   : > { %v2184_v34 = vpop.eup %2183 }
 0x4c8   : > { %v830_v35 = vsel %vm493_vm2, %v2184_v34, 0.0 }
 0x4c9   : > { %831 = vadd.xlane.f32.xlu1 %v830_v35 }
 0x4da   : > { %987 = vrot.lane.b32.xlu1 %v2440_v10, %s2286_s20  ;;  %s1897_s20 = sshll.u32 %s2383_s25, 8 }
 0x4de   : > { %985 = vrot.lane.b32.xlu1 %v2440_v10, %s2287_s26 }
 0x54a   : > { %v829_v37 = vpop.xlane.xlu1 %828 }
 0x54b   : > { %2185 = vrcp.f32 %v829_v37 }
 0x552   : > { %v832_v38 = vpop.xlane.xlu1 %831 }
 0x553   : > { %2187 = vrcp.f32 %v832_v38 }
 0x556   : > { %v988_v45 = vpop.permute.xlu1 %987 }
 0x557   : > { %v993_v48 = vsel %vm493_vm2, %v988_v45, 0 }
 0x558   : > { %v2186_v39 = vpop.eup %2185 }
 0x559   : > { %v835_v40 = vmul.f32 %v2186_v39, %v2182_v32 }
 0x55a   : > { %v986_v49 = vpop.permute.xlu1 %985 }
 0x55b   : > { %v837_v41 = vpack.c.bf16 %v835_v40, %v835_v40 }
 0x55d   : > { %1995 = vmatmul.mubr.msk.bf16.vlgmr.msra.gmra.mxu1 %vm493_vm2, %v837_v41 }
 0x55e   : > { %2005 = vmatpush3.bf16.xpose.msra.mxu1 %v943_v42  ;;  %2006 = vmatprep.mubr.msk.bf16.mxu1 %vm2280_vm0, %v2279_v1 }
 0x55f   : > { %2016 = vmatprep.subr.bf16.mxu1 %v2279_v1 }
 0x560   : > { %v2188_v43 = vpop.eup %2187 }
 0x561   : > { %v836_v44 = vmul.f32 %v2188_v43, %v2184_v34 }
 0x563   : > { %v838_v46 = vpack.c.bf16 %v836_v44, %v836_v44 }
 0x565   : > { %2001 = vmatmul.mubr.msk.bf16.vlgmr.msra.gmra.mxu0 %vm493_vm2, %v838_v46  ;;  %2007 = vmatmul.mubr.msk.bf16.vlgmr.msra.gmra.mxu1 %vm493_vm2, %v936_v47 }
 0x566   : > { %2011 = vmatpush3.bf16.xpose.msra.mxu0 %v993_v48  ;;  %2012 = vmatprep.mubr.msk.bf16.mxu0 %vm2280_vm0, %v2279_v1 }
 0x567   : > { %2022 = vmatprep.subr.bf16.mxu0 %v2279_v1  ;;  %2018 = vmatprep.mubr.msk.bf16.mxu1 %vm2280_vm0, %v2279_v1 }
 0x56d   : > { %2013 = vmatmul.mubr.msk.bf16.vlgmr.msra.gmra.mxu0 %vm493_vm2, %v986_v49 }
 0x56e   : > { %2024 = vmatprep.mubr.msk.bf16.mxu0 %vm2280_vm0, %v2279_v1 }
 0x61d   : > { %v2531_v50 = vpop.f32.mrf.mxu1 }
 0x61f   : > { %v1996_v51 = vpop.f32.mrf.mxu1 }
 0x621   : > { %v884_v52 = vpop.f32.mrf.mxu1 }
 0x623   : > { %v1997_v53 = vpop.f32.mrf.mxu1 }
 0x625   : > { %v2533_v54 = vpop.f32.mrf.mxu0  ;;  %v979_v55 = vpop.f32.mrf.mxu1 }
 0x626   : > { %v2144_v56 = vpack.i.bf16 %v2533_v54, %v2531_v50  ;;  %v1035_v57 = vsel %vm2455_vm3, %v979_v55, -inf }
 0x627   : > { %v2002_v58 = vpop.f32.mrf.mxu0  ;;  %v2008_v59 = vpop.f32.mrf.mxu1  ;;  %v1037_v61 = vsel %vm493_vm2, %v1035_v57, -inf }
 0x628   : > { %1038 = vmax.xlane.f32.xlu0 %v1037_v61 }
 0x629   : > { %v932_v62 = vpop.f32.mrf.mxu0  ;;  %v982_v63 = vpop.f32.mrf.mxu1 }
 0x62b   : > { %v2003_v2 = vpop.f32.mrf.mxu0  ;;  %v2009_v5 = vpop.f32.mrf.mxu1 }
 0x62d   : > { %v1029_v6 = vpop.f32.mrf.mxu0 }
 0x62e   : > { %v1036_v8 = vsel %vm2455_vm3, %v1029_v6, -inf }
 0x62f   : > { %v2014_v9 = vpop.f32.mrf.mxu0  ;;  %v1040_v11 = vsel %vm493_vm2, %v1036_v8, -inf }
 0x630   : > { %1041 = vmax.xlane.f32.xlu1 %v1040_v11 }
 0x631   : > { %v1032_v12 = vpop.f32.mrf.mxu0 }
 0x633   : > { %v2015_v13 = vpop.f32.mrf.mxu0 }
 0x641   : > { %1061 = vrot.lane.b32.xlu1 %v2437_v7, %s2288_s28 }
 0x645   : > { %1159 = vrot.lane.b32.xlu1 %v2437_v7, %s2289_s29 }
 0x649   : > { %1209 = vrot.lane.b32.xlu1 %v2440_v10, %s2289_s29  ;;  %s2294_s29 = smov 24  }
 0x64d   : > { %1207 = vrot.lane.b32.xlu1 %v2440_v10, %s2290_s15 }
 0x6b1   : > { %v1039_v14 = vpop.xlane.xlu0 %1038 }
 0x6b2   : > { %v1043_v15 = vsub.f32 %v1035_v57, %v1039_v14 }
 0x6b4   : > { %v1045_v16 = vmul.f32 1.442695, %v1043_v15 }
 0x6b6   : > { %2189 = vpow2.f32 %v1045_v16 }
 0x6b9   : > { %v1042_v17 = vpop.xlane.xlu1 %1041 }
 0x6ba   : > { %v1044_v18 = vsub.f32 %v1036_v8, %v1042_v17 }
 0x6bc   : > { %v1047_v20 = vmul.f32 1.442695, %v1044_v18 }
 0x6bd   : > { %v1062_v21 = vpop.permute.xlu1 %1061 }
 0x6be   : > { %2191 = vpow2.f32 %v1047_v20  ;;  %v1067_v22 = vsel %vm621_vm4, %v1062_v21, 0 }
 0x6bf   : > { %2017 = vmatpush3.bf16.msra.mxu1 %v1067_v22 }
 0x6c0   : > { %2028 = vmatprep.subr.bf16.mxu1 %v2279_v1 }
 0x6c1   : > { %v1160_v33 = vpop.permute.xlu1 %1159 }
 0x6c2   : > { %v1165_v35 = vsel %vm493_vm2, %v1160_v33, 0 }
 0x6c3   : > { %v2190_v23 = vpop.eup %2189 }
 0x6c4   : > { %v1049_v24 = vsel %vm493_vm2, %v2190_v23, 0.0 }
 0x6c5   : > { %1050 = vadd.xlane.f32.xlu0 %v1049_v24  ;;  %v1210_v38 = vpop.permute.xlu1 %1209 }
 0x6c6   : > { %v1215_v41 = vsel %vm493_vm2, %v1210_v38, 0 }
 0x6c9   : > { %v1208_v42 = vpop.permute.xlu1 %1207 }
 0x6cb   : > { %v2192_v25 = vpop.eup %2191 }
 0x6cc   : > { %v1052_v26 = vsel %vm493_vm2, %v2192_v25, 0.0 }
 0x6cd   : > { %1053 = vadd.xlane.f32.xlu0 %v1052_v26 }
 0x6e3   : > { %1109 = vrot.lane.b32.xlu0 %v2440_v10, %s2288_s28  ;;  %s405_s28 = sand.u32 1, %s2269_s22  }
 0x6e7   : > { %1157 = vrot.lane.b32.xlu0 %v2437_v7, %s2290_s15  ;;  %s2686_s15 = scalar_lea.hbm %s2744_s12, %s1897_s20 }
 0x74e   : > { %v1051_v27 = vpop.xlane.xlu0 %1050 }
 0x74f   : > { %2193 = vrcp.f32 %v1051_v27  ;;  %v2161_v27 = vld [vmem:[%s2734_s2 + $0x8] sm:$0xff]  }
 0x756   : > { %v1054_v28 = vpop.xlane.xlu0 %1053 }
 0x757   : > { %2195 = vrcp.f32 %v1054_v28  ;;  %v2162_v28 = vld [vmem:[%s2734_s2] sm:$0xff]  }
 0x75a   : > { %v1110_v29 = vpop.permute.xlu0 %1109 }
 0x75b   : > { %v1115_v30 = vsel %vm621_vm4, %v1110_v29, 0 }
 0x75c   : > { %v2194_v31 = vpop.eup %2193  ;;  %2023 = vmatpush3.bf16.msra.mxu0 %v1115_v30 }
 0x75d   : > { %v1057_v32 = vmul.f32 %v2194_v31, %v2190_v23  ;;  %2034 = vmatprep.subr.bf16.mxu0 %v2279_v1 }
 0x75e   : > { %v1158_v40 = vpop.permute.xlu0 %1157 }
 0x75f   : > { %v1059_v34 = vpack.c.bf16 %v1057_v32, %v1057_v32 }
 0x761   : > { %2019 = vmatmul.mubr.msk.bf16.vlgmr.msra.gmra.mxu1 %vm493_vm2, %v1059_v34 }
 0x762   : > { %2029 = vmatpush3.bf16.xpose.msra.mxu1 %v1165_v35  ;;  %2030 = vmatprep.mubr.msk.bf16.mxu1 %vm2280_vm0, %v2279_v1 }
 0x763   : > { %2040 = vmatprep.subr.bf16.mxu1 %v2279_v1 }
 0x764   : > { %v2196_v36 = vpop.eup %2195 }
 0x765   : > { %v1058_v37 = vmul.f32 %v2196_v36, %v2192_v25 }
 0x767   : > { %v1060_v39 = vpack.c.bf16 %v1058_v37, %v1058_v37 }
 0x769   : > { %2025 = vmatmul.mubr.msk.bf16.vlgmr.msra.gmra.mxu0 %vm493_vm2, %v1060_v39  ;;  %2031 = vmatmul.mubr.msk.bf16.vlgmr.msra.gmra.mxu1 %vm493_vm2, %v1158_v40 }
 0x76a   : > { %2035 = vmatpush3.bf16.xpose.msra.mxu0 %v1215_v41  ;;  %2036 = vmatprep.mubr.msk.bf16.mxu0 %vm2280_vm0, %v2279_v1 }
 0x76b   : > { %2046 = vmatprep.subr.bf16.mxu0 %v2279_v1  ;;  %2042 = vmatprep.mubr.msk.bf16.mxu1 %vm2280_vm0, %v2279_v1 }
 0x771   : > { %2037 = vmatmul.mubr.msk.bf16.vlgmr.msra.gmra.mxu0 %vm493_vm2, %v1208_v42 }
 0x772   : > { %2048 = vmatprep.mubr.msk.bf16.mxu0 %vm2280_vm0, %v2279_v1 }
 0x821   : > { %v1103_v43 = vpop.f32.mrf.mxu1 }
 0x823   : > { %v2020_v44 = vpop.f32.mrf.mxu1 }
 0x825   : > { %v1106_v45 = vpop.f32.mrf.mxu1 }
 0x827   : > { %v2021_v46 = vpop.f32.mrf.mxu1 }
 0x829   : > { %v1151_v47 = vpop.f32.mrf.mxu0  ;;  %v1201_v48 = vpop.f32.mrf.mxu1 }
 0x82a   : > { %v1257_v49 = vsel %vm2455_vm3, %v1201_v48, -inf  ;;  %v2149_v8 = vpack.i.bf16 %v1151_v47, %v1103_v43 }
 0x82b   : > { %v2026_v51 = vpop.f32.mrf.mxu0  ;;  %v2032_v52 = vpop.f32.mrf.mxu1  ;;  %v1259_v53 = vsel %vm493_vm2, %v1257_v49, -inf }
 0x82c   : > { %1260 = vmax.xlane.f32.xlu0 %v1259_v53 }
 0x82d   : > { %v1154_v55 = vpop.f32.mrf.mxu0  ;;  %v1204_v57 = vpop.f32.mrf.mxu1 }
 0x82e   : > { %v1869_v57 = vld [vmem:[%s2735_s3] ss:$0 sm:$0xff] }
 0x82f   : > { %v2027_v58 = vpop.f32.mrf.mxu0  ;;  %v2033_v59 = vpop.f32.mrf.mxu1 }
 0x831   : > { %v1251_v61 = vpop.f32.mrf.mxu0 }
 0x832   : > { %v1258_v62 = vsel %vm2455_vm3, %v1251_v61, -inf }
 0x833   : > { %v2038_v63 = vpop.f32.mrf.mxu0  ;;  %v1262_v2 = vsel %vm493_vm2, %v1258_v62, -inf }
 0x834   : > { %1263 = vmax.xlane.f32.xlu1 %v1262_v2 }
 0x835   : > { %v1254_v5 = vpop.f32.mrf.mxu0 }
 0x837   : > { %v2039_v6 = vpop.f32.mrf.mxu0 }
 0x845   : > { %1283 = vrot.lane.b32.xlu1 %v2437_v7, %s2291_s16 }
 0x849   : > { %2145 = vrot.lane.b32.xlu1 %v2144_v56, %s2745_s17 }
 0x84d   : > { %2150 = vrot.lane.b32.xlu1 %v2149_v8, %s2293_s18  ;;  %s2691_s18 = scalar_lea.sflag [#allocation3], %s405_s28 }
 0x8b5   : > { %v1261_v19 = vpop.xlane.xlu0 %1260 }
 0x8b6   : > { %v1265_v9 = vsub.f32 %v1257_v49, %v1261_v19 }
 0x8b8   : > { %v1267_v11 = vmul.f32 1.442695, %v1265_v9 }
 0x8ba   : > { %2197 = vpow2.f32 %v1267_v11 }
 0x8bd   : > { %v1264_v12 = vpop.xlane.xlu1 %1263 }
 0x8be   : > { %v1266_v13 = vsub.f32 %v1258_v62, %v1264_v12 }
 0x8c0   : > { %v1269_v14 = vmul.f32 1.442695, %v1266_v13 }
 0x8c1   : > { %v1284_v15 = vpop.permute.xlu1 %1283 }
 0x8c2   : > { %2199 = vpow2.f32 %v1269_v14  ;;  %v1289_v7 = vsel %vm621_vm4, %v1284_v15, 0 }
 0x8c3   : > { %2041 = vmatpush3.bf16.msra.mxu1 %v1289_v7 }
 0x8c4   : > { %2052 = vmatprep.subr.bf16.mxu1 %v2279_v1 }
 0x8c5   : > { %v2146_v38 = vpop.permute.xlu1 %2145 }
 0x8c6   : > { %v2148_v40 = vunpack.i.h.bf16 %v2146_v38  ;;  %v2147_v41 = vunpack.i.l.bf16 %v2146_v38  ;;  %v2172_v38 = vld [vmem:[%s2740_s8] sm:$0xff]  }
 0x8c7   : > { %v2198_v16 = vpop.eup %2197 }
 0x8c8   : > { %v1271_v50 = vsel %vm493_vm2, %v2198_v16, 0.0  ;;  %v1404_v45 = vsel %vm493_vm2, %v2495_v0, %v2148_v40  ;;  %v1403_v46 = vsel %vm493_vm2, %v2493_v60, %v2147_v41 }
 0x8c9   : > { %1272 = vadd.xlane.f32.xlu0 %v1271_v50  ;;  %v2151_v39 = vpop.permute.xlu1 %2150  ;;  %v2165_v50 = vld [vmem:[%s2740_s8 + $0x38] sm:$0xff]  }
 0x8ca   : > { %v2153_v42 = vunpack.i.h.bf16 %v2151_v39  ;;  %v2152_v43 = vunpack.i.l.bf16 %v2151_v39  ;;  %v1875_v39 = vld [vmem:[%s2739_s7] ss:$0 sm:$0xff] }
 0x8cc   : > { %v1406_v49 = vsel %vm1405_vm5, %v1403_v46, %v2152_v43  ;;  %v1407_v51 = vsel %vm1405_vm5, %v1404_v45, %v2153_v42 }
 0x8cf   : > { %v2200_v54 = vpop.eup %2199 }
 0x8d0   : > { %v1274_v56 = vsel %vm493_vm2, %v2200_v54, 0.0 }
 0x8d1   : > { %1275 = vadd.xlane.f32.xlu0 %v1274_v56 }
 0x8e7   : > { %1331 = vrot.lane.b32.xlu0 %v2440_v10, %s2291_s16  ;;  %s1845_s16 = sshll.u32 %s405_s28, 4 }
 0x8e8   : > { %s407_s26 = scalar_lea.vmem [#allocation2], %s1845_s16  ;;  %s2295_s16 = smov [#allocation2]  }
 0x8e9   : > { %s1779_s17 = sshll.u32 %s407_s26, 4  ;;  %s2221_s19 = sshll.u32 %s2295_s16, 4  ;;  %s2688_s17 = int_to_ptr.vmem [resolvable:$true] %s1779_s17  ;;  %s2222_s19 = int_to_ptr.vmem [resolvable:$false] %s2221_s19 }
 0x8ea   : > { %s2217_s25 = scalar_lea.vmem %s2688_s17, 256  ;;  %s2223_s0 = scalar_lea.vmem %s2222_s19, 512 }
 0x8eb   : > { %p2218_p11 = scmp.ne.s32.totalorder %s2688_s17, %s2217_s25  ;;  %p2224_p0 = scmp.lt.s32.totalorder %s2688_s17, %s2222_s19 }
 0x8ec   : > { %p2225_p1 = scmp.lt.s32.totalorder %s2223_s0, %s2217_s25 }
 0x8ed   : > { %p2219_p12 = pnand %p2218_p11, %p2400_p5 }
 0x8ee   : > { %p2226_p2 = por %p2225_p1, %p2224_p0 }
 0x8ef   : > { %p2220_p13 = pneg %p2219_p12 }
 0x8f1   : > { %p2227_p3 = pnand %p2226_p2, %p2220_p13 }
 0x952   : > { %v1273_v17 = vpop.xlane.xlu0 %1272 }
 0x953   : > { %2201 = vrcp.f32 %v1273_v17 }
 0x95a   : > { %v1276_v18 = vpop.xlane.xlu0 %1275 }
 0x95b   : > { %2203 = vrcp.f32 %v1276_v18 }
 0x95e   : > { %v1332_v20 = vpop.permute.xlu0 %1331 }
 0x95f   : > { %v1337_v21 = vsel %vm621_vm4, %v1332_v20, 0 }
 0x960   : > { %v2202_v22 = vpop.eup %2201  ;;  %2047 = vmatpush3.bf16.msra.mxu0 %v1337_v21 }
 0x961   : > { %v1279_v23 = vmul.f32 %v2202_v22, %v2198_v16  ;;  %2060 = vmatprep.subr.bf16.mxu0 %v2279_v1  ;;  %v2164_v16 = vld [vmem:[%s2738_s6] sm:$0xff]  }
 0x963   : > { %v1281_v24 = vpack.c.bf16 %v1279_v23, %v1279_v23 }
 0x965   : > { %2043 = vmatmul.mubr.msk.bf16.vlgmr.msra.gmra.mxu1 %vm493_vm2, %v1281_v24  ;;  %v1873_v24 = vld [vmem:[%s2736_s4] ss:$0 sm:$0xff] }
 0x966   : > { %2056 = vmatprep.mubr.msk.bf16.mxu1 %vm2280_vm0, %v2279_v1  ;;  %2053 = vmatpush3.bf16.msra.mxu1 %v2161_v27  ;;  %v1874_v27 = vld [vmem:[%s2737_s5] ss:$0 sm:$0xff] }
 0x967   : > { %2054 = vmatprep.subr.bf16.mxu1 %v2279_v1 }
 0x968   : > { %v2204_v25 = vpop.eup %2203 }
 0x969   : > { %v1280_v10 = vmul.f32 %v2204_v25, %v2200_v54 }
 0x96a   : > { %2055 = vmatpush3.bf16.msra.mxu1 %v2162_v28 }
 0x96b   : > { %v1282_v26 = vpack.c.bf16 %v1280_v10, %v1280_v10  ;;  %2068 = vmatprep.subr.bf16.mxu1 %v2279_v1 }
 0x96d   : > { %2049 = vmatmul.mubr.msk.bf16.vlgmr.msra.gmra.mxu0 %vm493_vm2, %v1282_v26 }
 0x96e   : > { %2064 = vmatprep.mubr.msk.bf16.mxu0 %vm2280_vm0, %v2279_v1 }
 0xa25   : > { %v1325_v29 = vpop.f32.mrf.mxu1 }
 0xa27   : > { %v2044_v30 = vpop.f32.mrf.mxu1 }
 0xa29   : > { %v1328_v31 = vpop.f32.mrf.mxu1 }
 0xa2b   : > { %v2045_v32 = vpop.f32.mrf.mxu1 }
 0xa2c   : > { %v2166_v32 = vld [vmem:[%s2740_s8 + $0x30] sm:$0xff]  }
 0xa2d   : > { %v1373_v33 = vpop.f32.mrf.mxu0 }
 0xa2e   : > { %v2154_v34 = vpack.i.bf16 %v1373_v33, %v1325_v29  ;;  %v2167_v33 = vld [vmem:[%s2740_s8 + $0x28] sm:$0xff]  }
 0xa2f   : > { %v2050_v35 = vpop.f32.mrf.mxu0 }
 0xa30   : > { %2155 = vrot.lane.b32.xlu0 %v2154_v34, %s2294_s29  ;;  %v2168_v34 = vld [vmem:[%s2740_s8 + $0x20] sm:$0xff]   ;;  %v2169_v35 = vld [vmem:[%s2740_s8 + $0x18] sm:$0xff]  }
 0xa31   : > { %v1376_v36 = vpop.f32.mrf.mxu0 }
 0xa32   : > { %v2170_v36 = vld [vmem:[%s2740_s8 + $0x10] sm:$0xff]  }
 0xa33   : > { %v2051_v37 = vpop.f32.mrf.mxu0 }
 0xa34   : > { %v2171_v37 = vld [vmem:[%s2740_s8 + $0x8] sm:$0xff]  }
 0xaa2   : > { %v2156_v44 = vpop.permute.xlu0 %2155 }
 0xaa3   : > { %v2158_v47 = vunpack.i.h.bf16 %v2156_v44  ;;  %v2157_v48 = vunpack.i.l.bf16 %v2156_v44 }
 0xaa5   : > { %v1410_v52 = vsel %vm1408_vm6, %v1407_v51, %v2158_v47  ;;  %v1409_v53 = vsel %vm1408_vm6, %v1406_v49, %v2157_v48 }
 0xaa6   : > { %v1411_v55 = vpack.c.bf16 %v1410_v52, %v1409_v53 }
 0xaa8   : > { %2057 = vmatmul.mubr.msk.bf16.vlgmr.msra.gmra.mxu1 %vm435_vm1, %v1411_v55 }
 0xaa9   : > { %2084 = vmatprep.mubr.msk.bf16.mxu1 %vm2280_vm0, %v2279_v1  ;;  %2069 = vmatpush3.bf16.msra.mxu1 %v2165_v50 }
 0xaaa   : > { %2070 = vmatprep.subr.bf16.mxu1 %v2279_v1 }
 0xaad   : > { %2071 = vmatpush3.bf16.msra.mxu1 %v2166_v32 }
 0xaae   : > { %2072 = vmatprep.subr.bf16.mxu1 %v2279_v1 }
 0xab1   : > { %2073 = vmatpush3.bf16.msra.mxu1 %v2167_v33 }
 0xab2   : > { %2074 = vmatprep.subr.bf16.mxu1 %v2279_v1 }
 0xab5   : > { %2075 = vmatpush3.bf16.msra.mxu1 %v2168_v34 }
 0xab6   : > { %2076 = vmatprep.subr.bf16.mxu1 %v2279_v1 }
 0xab9   : > { %2077 = vmatpush3.bf16.msra.mxu1 %v2169_v35 }
 0xaba   : > { %2078 = vmatprep.subr.bf16.mxu1 %v2279_v1 }
 0xabd   : > { %2079 = vmatpush3.bf16.msra.mxu1 %v2170_v36 }
 0xabe   : > { %2080 = vmatprep.subr.bf16.mxu1 %v2279_v1 }
 0xac1   : > { %2081 = vmatpush3.bf16.msra.mxu1 %v2171_v37 }
 0xac2   : > { %2082 = vmatprep.subr.bf16.mxu1 %v2279_v1 }
 0xac5   : > { %2083 = vmatpush3.bf16.msra.mxu1 %v2172_v38 }
 0xb68   : > { %v1472_v0 = vpop.f32.mrf.mxu1 }
 0xb69   : > { %v1473_v58 = vadd.f32 %v1869_v57, %v1472_v0 }
 0xb6a   : > { %v2058_v59 = vpop.f32.mrf.mxu1 }
 0xb6b   : > { %v1479_v60 = vadd.f32 %v1473_v58, %v2428_v3  ;;  %v1879_v58 = vld [vmem:[%s2741_s9] ss:$0 sm:$0xff] }
 0xb6c   : > { %v1475_v61 = vpop.f32.mrf.mxu1 }
 0xb6d   : > { %v1476_v62 = vadd.f32 %v1869_v57, %v1475_v61  ;;  %v1483_v63 = vsel %vm435_vm1, %v1479_v60, 0.0 }
 0xb6e   : > { %1484 = vadd.xlane.f32.xlu1 %v1483_v63  ;;  %v2059_v2 = vpop.f32.mrf.mxu1 }
 0xb6f   : > { %v1480_v5 = vadd.f32 %v1476_v62, %v2430_v4  ;;  %v2163_v4 = vld [vmem:[%s2738_s6 + $0x8] sm:$0xff]  }
 0xb70   : > { %2061 = vmatpush3.bf16.msra.mxu0 %v2163_v4 }
 0xb71   : > { %v1486_v6 = vsel %vm435_vm1, %v1480_v5, 0.0  ;;  %2062 = vmatprep.subr.bf16.mxu0 %v2279_v1 }
 0xb72   : > { %1487 = vadd.xlane.f32.xlu0 %v1486_v6 }
 0xb74   : > { %2063 = vmatpush3.bf16.msra.mxu0 %v2164_v16 }
 0xbf7   : > { %v1485_v8 = vpop.xlane.xlu1 %1484 }
 0xbf8   : > { %v1490_v19 = vmul.f32 0.03125, %v1485_v8 }
 0xbfa   : > { %v1492_v9 = vsub.f32 %v1479_v60, %v1490_v19 }
 0xbfb   : > { %v1488_v11 = vpop.xlane.xlu0 %1487 }
 0xbfc   : > { %v1491_v12 = vmul.f32 0.03125, %v1488_v11  ;;  %v1494_v13 = vmul.f32 %v1492_v9, %v1492_v9 }
 0xbfe   : > { %v1493_v14 = vsub.f32 %v1480_v5, %v1491_v12  ;;  %v1496_v3 = vsel %vm435_vm1, %v1494_v13, 0.0 }
 0xbff   : > { %1497 = vadd.xlane.f32.xlu0 %v1496_v3 }
 0xc00   : > { %v1495_v15 = vmul.f32 %v1493_v14, %v1493_v14 }
 0xc02   : > { %v1499_v7 = vsel %vm435_vm1, %v1495_v15, 0.0 }
 0xc03   : > { %1500 = vadd.xlane.f32.xlu1 %v1499_v7 }
 0xc88   : > { %v1498_v54 = vpop.xlane.xlu0 %1497 }
 0xc89   : > { %v1502_v56 = vmul.f32 0.03125, %v1498_v54 }
 0xc8b   : > { %v1504_v17 = vadd.f32 1e-05, %v1502_v56 }
 0xc8c   : > { %v1501_v18 = vpop.xlane.xlu1 %1500 }
 0xc8d   : > { %2205 = vrsqrt.f32 %v1504_v17  ;;  %v1503_v20 = vmul.f32 0.03125, %v1501_v18 }
 0xc8f   : > { %v1505_v21 = vadd.f32 1e-05, %v1503_v20 }
 0xc91   : > { %2207 = vrsqrt.f32 %v1505_v21 }
 0xc9a   : > { %v2206_v22 = vpop.eup %2205 }
 0xc9b   : > { %v1508_v23 = vmul.f32 %v2206_v22, %v1492_v9  ;;  %v1888_v22 = vld [vmem:[%s2742_s10] ss:$0 sm:$0xff] }
 0xc9d   : > { %v1516_v26 = vmul.f32 %v1873_v24, %v1508_v23 }
 0xc9e   : > { %v2208_v25 = vpop.eup %2207 }
 0xc9f   : > { %v1509_v10 = vmul.f32 %v2208_v25, %v1493_v14  ;;  %v1524_v29 = vadd.f32 %v1874_v27, %v1516_v26 }
 0xca1   : > { %v1517_v28 = vmul.f32 %v1873_v24, %v1509_v10  ;;  %v1889_v24 = vld [vmem:[%s2743_s11] ss:$0 sm:$0xff] }
 0xca3   : > { %v1525_v30 = vadd.f32 %v1874_v27, %v1517_v28 }
 0xca5   : > { %v1526_v31 = vpack.c.bf16 %v1525_v30, %v1524_v29 }
 0xca7   : > { %2065 = vmatmul.mubr.msk.bf16.vlgmr.msra.gmra.mxu0 %vm435_vm1, %v1526_v31 }
 0xd67   : > { %v1587_v40 = vpop.f32.mrf.mxu0 }
 0xd68   : > { %v1588_v41 = vadd.f32 %v1875_v39, %v1587_v40 }
 0xd69   : > { %v2066_v42 = vpop.f32.mrf.mxu0 }
 0xd6a   : > { %v1596_v43 = vmul.f32 0.70710677, %v1588_v41  ;;  %v1594_v51 = vmul.f32 0.5, %v1588_v41 }
 0xd6b   : > { %v1590_v44 = vpop.f32.mrf.mxu0 }
 0xd6c   : > { %2209 = verf.f32 %v1596_v43  ;;  %v1591_v45 = vadd.f32 %v1875_v39, %v1590_v44 }
 0xd6d   : > { %v2067_v46 = vpop.f32.mrf.mxu0 }
 0xd6e   : > { %v1597_v47 = vmul.f32 0.70710677, %v1591_v45  ;;  %v1595_v52 = vmul.f32 0.5, %v1591_v45 }
 0xd70   : > { %2211 = verf.f32 %v1597_v47 }
 0xd79   : > { %v2210_v1 = vpop.eup %2209 }
 0xd7a   : > { %v1600_v48 = vadd.f32 1.0, %v2210_v1 }
 0xd7c   : > { %v1602_v55 = vmul.f32 %v1600_v48, %v1594_v51 }
 0xd7d   : > { %v2212_v49 = vpop.eup %2211 }
 0xd7e   : > { %v1601_v53 = vadd.f32 1.0, %v2212_v49 }
 0xd80   : > { %v1603_v57 = vmul.f32 %v1601_v53, %v1595_v52 }
 0xd82   : > { %v1604_v0 = vpack.c.bf16 %v1603_v57, %v1602_v55 }
 0xd84   : > { %2085 = vmatmul.mubr.bf16.vlgmr.msra.gmra.mxu1 %v1604_v0 }
 0xe44   : > { %v1710_v59 = vpop.f32.mrf.mxu1 }
 0xe45   : > { %v1711_v60 = vadd.f32 %v1879_v58, %v1710_v59 }
 0xe46   : > { %v2086_v61 = vpop.f32.mrf.mxu1 }
 0xe47   : > { %v1717_v62 = vadd.f32 %v1711_v60, %v1524_v29 }
 0xe48   : > { %v1713_v63 = vpop.f32.mrf.mxu1 }
 0xe49   : > { %v1714_v2 = vadd.f32 %v1879_v58, %v1713_v63  ;;  %v1721_v5 = vsel %vm435_vm1, %v1717_v62, 0.0 }
 0xe4a   : > { %1722 = vadd.xlane.f32.xlu0 %v1721_v5  ;;  %v2087_v6 = vpop.f32.mrf.mxu1 }
 0xe4b   : > { %v1718_v8 = vadd.f32 %v1714_v2, %v1525_v30 }
 0xe4d   : > { %v1724_v19 = vsel %vm435_vm1, %v1718_v8, 0.0 }
 0xe4e   : > { %1725 = vadd.xlane.f32.xlu1 %v1724_v19 }
 0xed3   : > { %v1723_v9 = vpop.xlane.xlu0 %1722 }
 0xed4   : > { %v1727_v11 = vmul.f32 0.03125, %v1723_v9 }
 0xed6   : > { %v1729_v12 = vsub.f32 %v1717_v62, %v1727_v11 }
 0xed7   : > { %v1726_v13 = vpop.xlane.xlu1 %1725 }
 0xed8   : > { %v1728_v14 = vmul.f32 0.03125, %v1726_v13  ;;  %v1731_v3 = vmul.f32 %v1729_v12, %v1729_v12 }
 0xeda   : > { %v1730_v15 = vsub.f32 %v1718_v8, %v1728_v14  ;;  %v1733_v7 = vsel %vm435_vm1, %v1731_v3, 0.0 }
 0xedb   : > { %1734 = vadd.xlane.f32.xlu0 %v1733_v7 }
 0xedc   : > { %v1732_v4 = vmul.f32 %v1730_v15, %v1730_v15 }
 0xede   : > { %v1736_v16 = vsel %vm435_vm1, %v1732_v4, 0.0 }
 0xedf   : > { %1737 = vadd.xlane.f32.xlu1 %v1736_v16 }
 0xf64   : > { %v1735_v50 = vpop.xlane.xlu0 %1734 }
 0xf65   : > { %v1739_v54 = vmul.f32 0.03125, %v1735_v50 }
 0xf67   : > { %v1741_v56 = vadd.f32 1e-05, %v1739_v54 }
 0xf68   : > { %v1738_v17 = vpop.xlane.xlu1 %1737 }
 0xf69   : > { %2213 = vrsqrt.f32 %v1741_v56  ;;  %v1740_v18 = vmul.f32 0.03125, %v1738_v17 }
 0xf6b   : > { %v1742_v20 = vadd.f32 1e-05, %v1740_v18 }
 0xf6d   : > { %2215 = vrsqrt.f32 %v1742_v20 }
 0xf76   : > { %v2214_v21 = vpop.eup %2213 }
 0xf77   : > { %v1745_v23 = vmul.f32 %v2214_v21, %v1729_v12 }
 0xf79   : > { %v1753_v25 = vmul.f32 %v1888_v22, %v1745_v23 }
 0xf7a   : > { %v2216_v10 = vpop.eup %2215 }
 0xf7b   : > { %v1746_v26 = vmul.f32 %v2216_v10, %v1730_v15  ;;  %v1761_v27 = vadd.f32 %v1889_v24, %v1753_v25 }
 0xf7d   : > { %v1754_v28 = vmul.f32 %v1888_v22, %v1746_v26  ;;  %1763 = vst.msk [vmem:[%s407_s26] sm:$0xff] %vm435_vm1, %v1761_v27 }
 0xf7f   : > { %v1762_v29 = vadd.f32 %v1889_v24, %v1754_v28 }
 0xf81   : > { %1764 = vst.msk [vmem:[%s407_s26 + $0x8] sm:$0xff] %vm435_vm1, %v1762_v29 }
 0xf82   : > { %2230 = shalt.err (!%p2227_p3)
}
 0xf83   : > { %s2231_s28 = scalar_lea.hbm %s2686_s15, 256  ;;  %s2235_s29 = scalar_lea.hbm %s2744_s12, 512 }
 0xf84   : > { %p2232_p4 = scmp.ne.s32.totalorder %s2686_s15, %s2231_s28  ;;  %p2236_p9 = scmp.lt.s32.totalorder %s2686_s15, %s2744_s12 }
 0xf85   : > { %p2237_p10 = scmp.lt.s32.totalorder %s2235_s29, %s2231_s28 }
 0xf86   : > { %p2233_p7 = pnand %p2232_p4, %p2400_p5 }
 0xf87   : > { %p2238_p11 = por %p2237_p10, %p2236_p9 }
 0xf88   : > { %p2234_p8 = pneg %p2233_p7 }
 0xf8a   : > { %p2239_p12 = pnand %p2238_p11, %p2234_p8 }
 0xf8c   : > { %2242 = shalt.err (!%p2239_p12)
}
 0xf8d   : > { %s2296_s25 = smov 128   ;;  %s2754_s19 = smov 8  }
 0xf8e   : > { %2088 = dma.vmem_to_hbm [thread:$0]  (%p2400_p5), %s2688_s17, 256, %s2686_s15, %s2691_s18, %s2296_s25, %s2296_s25, %s2754_s19  }
 0xf8f PF: > { %p2094_p13 = scmp.ge.s32.totalorder %s2277_s24, 2  ;;  %s1794_s0 = sand.u32 1, %s2265_s21  }
 0xf90   : > { %s1795_s1 = scalar_lea.sflag [#allocation3], %s1794_s0 }
 0xf91   : > { %p2091_p0 = pnand %p2094_p13, %p2404_p6 }
 0xf93   : > { %p2092_p1 = pneg %p2091_p0 }
 0xf95   : > { %2260 = dma.done.wait (%p2092_p1), %s1795_s1, 256  }
 0xf96   : > { %2262 = vsyncadd (%p2092_p1), %s1795_s1, 4294967040  ;;  %p22_p2 = scmp.ge.s32.totalorder %s2387_s27, 4   ;;  %s2755_s21 = smov %s2269_s22 }
 0xf97   : > { %s2756_s22 = smov %s2273_s23  ;;  %s2757_s23 = smov %s2398_s30 }
 0xf98   : > { %s2758_s24 = smov %s2387_s27  ;;  %24 = sbr.rel (!%p22_p2) target bundleno = 6 (0x6), region = 103 }
 0xf9d   :  { %1800 = vsyncpa [#allocation3], 1 }
 0xf9e   :  { %1802 = vsyncpa [#allocation3 + $0x1], 1 }

</bundles_post_ra>
